<compile_context>
chip_gen: v7x
topology: tpu7x:2x2x1
jax: 0.10.0
libtpu: 0.0.40
codegen_flags: <defaults>
</compile_context>

<pallas_src>
import jax
import jax.numpy as jnp
from jax.experimental import pallas as pl
from jax.experimental.pallas import tpu as pltpu


H = W = 16
C_IN = 1
FILTERS = 8
ENC_H = ENC_W = 8                        # spatial size after the stride-2 conv
ENCODER_DIM = FILTERS * ENC_H * ENC_W    # 512
AFFINE_DIM = 32
LATENT_DIM = 8
KSIZE = 3


# ---------------------------------------------------------------------------
# The single fused kernel (whole batch, whole network, one launch).
# ---------------------------------------------------------------------------
def _vae_kernel(x_ref, eps_ref,
                rb1_ref, mc1_ref, b1_ref,
                rb2_ref, mc2_ref, b2_ref,
                wcat_ref, baff_ref, sel_ref,
                whead_ref, bhead_ref,
                wd1_ref, bd1_ref,
                wd2_ref, bd2_ref, place_ref,
                rb3_ref, mc3_ref, b3_ref,
                rb4_ref, mc4_ref, b4_ref,
                recon_ref, mu_ref, lv_ref):
    f32, bf16 = jnp.float32, jnp.bfloat16

    def mxu(a, b):
        return jnp.dot(a, b, preferred_element_type=f32)

    def conv(act_f32, rb_ref, mcat_ref, b_ref, wc):
        # One wide matmul over all 3 H-taps, then 3 independent block-diag
        # R-matmuls (stride / padding / tap folding) summed on the VPU.
        t = mxu(act_f32.astype(bf16), mcat_ref[...]).astype(bf16)   # (rows_in, 3*wc)
        acc = b_ref[...]                                            # (1, wc) bias
        for d in range(KSIZE):
            acc = acc + mxu(rb_ref[d], t[:, d * wc:(d + 1) * wc])
        return acc                                                  # (rows_out, wc) f32

    wcf = ENC_W * FILTERS                                           # 64

    # ------------------------------ encoder ------------------------------
    x = x_ref[...]                                                  # (B*16, 16) f32
    h1 = jnp.maximum(conv(x, rb1_ref, mc1_ref, b1_ref, W * FILTERS), 0.0)        # (B*16, 128)
    h2 = jnp.maximum(conv(h1, rb2_ref, mc2_ref, b2_ref, wcf), 0.0)               # (B*8, 64)

    # Encoder affine 512 -> 32: NCHW flatten is folded into wcat (lane blocks
    # per encoder row) + tiny 0/1 selection matmuls; all samples batched.
    u = mxu(h2.astype(bf16), wcat_ref[...]).astype(bf16)            # (B*8, 8*32)
    aff = baff_ref[...]
    for r in range(ENC_H):
        aff = aff + mxu(sel_ref[r], u[:, r * AFFINE_DIM:(r + 1) * AFFINE_DIM])
    aff = jnp.maximum(aff, 0.0)                                     # (B, 32)
    # TODO(synk): encoder affine Dropout omitted (identity at inference).

    # Merged mu / logvar heads (32 -> 16) + fused reparameterization.
    head = mxu(aff.astype(bf16), whead_ref[...]) + bhead_ref[...]   # (B, 16)
    mu = head[:, :LATENT_DIM]
    lv = head[:, LATENT_DIM:2 * LATENT_DIM]
    mu_ref[...] = mu
    lv_ref[...] = lv
    z = mu + eps_ref[...] * jnp.exp(0.5 * lv)                       # (B, 8) f32

    # ------------------------------ decoder ------------------------------
    d1 = jnp.maximum(mxu(z.astype(bf16), wd1_ref[...]) + bd1_ref[...], 0.0)      # (B, 32)
    p = jnp.maximum(mxu(d1.astype(bf16), wd2_ref[...]) + bd2_ref[...], 0.0)      # (B, 512)

    # Un-flatten (B, 512) -> (B*8, 64) slab in registers via 0/1 placement
    # matmuls (replaces the old per-row VMEM scratch round trip).
    pb = p.astype(bf16)
    slab = mxu(place_ref[0], pb[:, 0:wcf])
    for r in range(1, ENC_H):
        slab = slab + mxu(place_ref[r], pb[:, r * wcf:(r + 1) * wcf])            # (B*8, 64)

    g1 = jnp.maximum(conv(slab, rb3_ref, mc3_ref, b3_ref, W * FILTERS), 0.0)     # (B*16, 128)
    logits = conv(g1, rb4_ref, mc4_ref, b4_ref, W * C_IN)                        # (B*16, 16)
    recon_ref[...] = jax.nn.sigmoid(logits)


# ---------------------------------------------------------------------------
# One-time constant construction (outside the hot path).
# ---------------------------------------------------------------------------
def _conv_taps(wt, hin, win, *, stride, pad, transposed, output_padding=0):
    """Per-tap constants so a (transposed) conv becomes: out = sum_d R[d] @ act @ M[d]."""
    if transposed:
        ic, oc, kh, kw = wt.shape                  # PyTorch ConvTranspose2d layout
        hout = (hin - 1) * stride - 2 * pad + kh + output_padding
        wout = (win - 1) * stride - 2 * pad + kw + output_padding
    else:
        oc, ic, kh, kw = wt.shape                  # PyTorch Conv2d layout
        hout = (hin + 2 * pad - kh) // stride + 1
        wout = (win + 2 * pad - kw) // stride + 1

    oh = jnp.arange(hout)[:, None]
    ih = jnp.arange(hin)[None, :]
    iw = jnp.arange(win)[:, None]
    ow = jnp.arange(wout)[None, :]

    r_list, m_list = [], []
    for di in range(kh):
        if transposed:
            r = (oh == stride * ih + di - pad)                     # (hout, hin)
        else:
            r = (ih == stride * oh + di - pad)                     # (hout, hin)
        r_list.append(r.astype(jnp.float32))

        m = jnp.zeros((win * ic, wout * oc), jnp.float32)
        for dj in range(kw):
            if transposed:
                p_sel = (ow == stride * iw + dj - pad)             # (win, wout)
                b_mix = wt[:, :, di, dj]                           # (ic, oc)
            else:
                p_sel = (iw == stride * ow + dj - pad)             # (win, wout)
                b_mix = wt[:, :, di, dj].T                         # (ic, oc)
            m = m + jnp.kron(p_sel.astype(jnp.float32), b_mix)
        m_list.append(m)
    return r_list, m_list, hout, wout


def _conv_consts(wt, hin, win, batch, **kw):
    """Batched constants: per-tap block-diag R (bf16, exact 0/1) and lane-concatenated M (bf16)."""
    r_list, m_list, _, _ = _conv_taps(wt, hin, win, **kw)
    eye = jnp.eye(batch, dtype=jnp.float32)
    rb = jnp.stack([jnp.kron(eye, r) for r in r_list])             # (3, B*hout, B*hin)
    mcat = jnp.concatenate(m_list, axis=1)                         # (win*ic, 3*wout*oc)
    return rb.astype(jnp.bfloat16), mcat.astype(jnp.bfloat16)


def init_params(key):
    ks = jax.random.split(key, 18)

    def init(k, shape, scale=0.1):
        return (scale * jax.random.normal(k, shape)).astype(jnp.float32)

    p = {}
    # Encoder convs (PyTorch Conv2d layout: (OC, IC, KH, KW)).
    p["conv1_w"] = init(ks[0], (FILTERS, C_IN, KSIZE, KSIZE));    p["conv1_b"] = init(ks[1], (FILTERS,))
    p["conv2_w"] = init(ks[2], (FILTERS, FILTERS, KSIZE, KSIZE)); p["conv2_b"] = init(ks[3], (FILTERS,))
    # Encoder affine + mu/logvar heads (PyTorch Linear layout: (out, in)).
    p["aff_w"] = init(ks[4], (AFFINE_DIM, ENCODER_DIM)); p["aff_b"] = init(ks[5], (AFFINE_DIM,))
    p["mu_w"] = init(ks[6], (LATENT_DIM, AFFINE_DIM));   p["mu_b"] = init(ks[7], (LATENT_DIM,))
    p["lv_w"] = init(ks[8], (LATENT_DIM, AFFINE_DIM));   p["lv_b"] = init(ks[9], (LATENT_DIM,))
    # Decoder affines.
    p["daff1_w"] = init(ks[10], (AFFINE_DIM, LATENT_DIM));  p["daff1_b"] = init(ks[11], (AFFINE_DIM,))
    p["daff2_w"] = init(ks[12], (ENCODER_DIM, AFFINE_DIM)); p["daff2_b"] = init(ks[13], (ENCODER_DIM,))
    # Decoder transposed convs (PyTorch ConvTranspose2d layout: (IC, OC, KH, KW)).
    p["dconv1_w"] = init(ks[14], (FILTERS, FILTERS, KSIZE, KSIZE)); p["dconv1_b"] = init(ks[15], (FILTERS,))
    p["dconv2_w"] = init(ks[16], (FILTERS, C_IN, KSIZE, KSIZE));    p["dconv2_b"] = init(ks[17], (C_IN,))
    return p


def preprocess_params(p, batch):
    bf16 = jnp.bfloat16
    eyeb = jnp.eye(batch, dtype=jnp.float32)
    onehot = jnp.eye(ENC_H, dtype=jnp.float32)
    c = {}

    # Encoder convs.
    c["rb1"], c["mc1"] = _conv_consts(p["conv1_w"], H, W, batch, stride=1, pad=1, transposed=False)
    c["b1"] = jnp.tile(p["conv1_b"], W)[None, :]                          # (1, 128) f32
    c["rb2"], c["mc2"] = _conv_consts(p["conv2_w"], H, W, batch, stride=2, pad=1, transposed=False)
    c["b2"] = jnp.tile(p["conv2_b"], ENC_W)[None, :]                      # (1, 64)

    # Encoder affine: fold the NCHW flatten (c*64 + h*8 + w) into the weight.
    # wcat[(w*8+c), (h*32+o)] = aff_w[o, c, h, w]
    t = p["aff_w"].reshape(AFFINE_DIM, FILTERS, ENC_H, ENC_W)             # (o, c, h, w)
    c["wcat"] = t.transpose(3, 1, 2, 0).reshape(ENC_W * FILTERS, ENC_H * AFFINE_DIM).astype(bf16)
    c["baff"] = p["aff_b"][None, :]
    # sel[h] (B, B*8): picks encoder row h of every sample.
    c["sel"] = jnp.stack([jnp.kron(eyeb, onehot[h][None, :]) for h in range(ENC_H)]).astype(bf16)

    # Merged mu / logvar heads.
    c["whead"] = jnp.concatenate([p["mu_w"].T, p["lv_w"].T], axis=1).astype(bf16)   # (32, 16)
    c["bhead"] = jnp.concatenate([p["mu_b"], p["lv_b"]])[None, :]                   # (1, 16) f32

    # Decoder affines; fold the (c, h, w) view of daff2 into its weight.
    c["wd1"] = p["daff1_w"].T.astype(bf16)                                # (8, 32)
    c["bd1"] = p["daff1_b"][None, :]
    t2 = p["daff2_w"].reshape(FILTERS, ENC_H, ENC_W, AFFINE_DIM)          # (c, h, w, k)
    c["wd2"] = t2.transpose(3, 1, 2, 0).reshape(AFFINE_DIM, ENCODER_DIM).astype(bf16)   # (32, 512)
    c["bd2"] = (p["daff2_b"].reshape(FILTERS, ENC_H, ENC_W)
                .transpose(1, 2, 0).reshape(1, ENCODER_DIM))              # (1, 512) f32
    # place[h] (B*8, B): scatters sample row into slab row n*8+h.
    c["place"] = jnp.stack([jnp.kron(eyeb, onehot[h][:, None]) for h in range(ENC_H)]).astype(bf16)

    # Decoder transposed convs.
    c["rb3"], c["mc3"] = _conv_consts(p["dconv1_w"], ENC_H, ENC_W, batch, stride=2, pad=1,
                                      transposed=True, output_padding=1)
    c["b3"] = jnp.tile(p["dconv1_b"], W)[None, :]                         # (1, 128)
    c["rb4"], c["mc4"] = _conv_consts(p["dconv2_w"], H, W, batch, stride=1, pad=1, transposed=True)
    c["b4"] = jnp.tile(p["dconv2_b"], W)[None, :]                         # (1, 16)
    return c


def _flop_estimate(nb):
    def dot_fl(m, k, n):
        return 2 * m * k * n

    def conv_fl(rows_in, k, wc, rows_out):
        return dot_fl(rows_in, k, KSIZE * wc) + KSIZE * dot_fl(rows_out, rows_in, wc)

    fl = 0
    fl += conv_fl(nb * H, W * C_IN, W * FILTERS, nb * H)                  # conv1
    fl += conv_fl(nb * H, W * FILTERS, ENC_W * FILTERS, nb * ENC_H)       # conv2
    fl += dot_fl(nb * ENC_H, ENC_W * FILTERS, ENC_H * AFFINE_DIM)         # encoder affine (wide)
    fl += ENC_H * dot_fl(nb, nb * ENC_H, AFFINE_DIM)                      # encoder affine (select)
    fl += dot_fl(nb, AFFINE_DIM, 2 * LATENT_DIM)                          # mu/logvar heads
    fl += dot_fl(nb, LATENT_DIM, AFFINE_DIM)                              # daff1
    fl += dot_fl(nb, AFFINE_DIM, ENCODER_DIM)                             # daff2
    fl += ENC_H * dot_fl(nb * ENC_H, nb, ENC_W * FILTERS)                 # slab placement
    fl += conv_fl(nb * ENC_H, ENC_W * FILTERS, W * FILTERS, nb * H)       # dconv1
    fl += conv_fl(nb * H, W * FILTERS, W * C_IN, nb * H)                  # dconv2
    transcendentals = nb * (LATENT_DIM + H * W)                           # exp + sigmoid
    return fl, transcendentals


# ---------------------------------------------------------------------------
# Forward pass: one pallas_call for the whole batched VAE.
# ---------------------------------------------------------------------------
def vae_forward(consts, x, eps):
    nb = x.shape[0]
    # NCHW -> (N*H, W*C) lane-dense slab (C_IN = 1).
    x2d = x.transpose(0, 2, 3, 1).reshape(nb * H, W * C_IN).astype(jnp.float32)

    args = (x2d, eps.astype(jnp.float32),
            consts["rb1"], consts["mc1"], consts["b1"],
            consts["rb2"], consts["mc2"], consts["b2"],
            consts["wcat"], consts["baff"], consts["sel"],
            consts["whead"], consts["bhead"],
            consts["wd1"], consts["bd1"],
            consts["wd2"], consts["bd2"], consts["place"],
            consts["rb3"], consts["mc3"], consts["b3"],
            consts["rb4"], consts["mc4"], consts["b4"])

    out_shape = (
        jax.ShapeDtypeStruct((nb * H, W), jnp.float32),       # reconstruction (rows = n*H + h)
        jax.ShapeDtypeStruct((nb, LATENT_DIM), jnp.float32),  # mu
        jax.ShapeDtypeStruct((nb, LATENT_DIM), jnp.float32),  # logvar
    )

    flops, transcendentals = _flop_estimate(nb)
    bytes_accessed = sum(int(a.size) * a.dtype.itemsize for a in args)
    bytes_accessed += (nb * H * W + 2 * nb * LATENT_DIM) * 4

    # Batch=2 fits one TensorCore; for larger batches a grid=(nb_tiles,) with
    # dimension_semantics=("parallel",) would shard across v7x's 2 TCs.
    recon2d, mu, logvar = pl.pallas_call(
        _vae_kernel,
        out_shape=out_shape,
        compiler_params=pltpu.CompilerParams(vmem_limit_bytes=16 * 1024 * 1024),
        cost_estimate=pl.CostEstimate(flops=flops,
                                      transcendentals=transcendentals,
                                      bytes_accessed=bytes_accessed),
    )(*args)

    recon = recon2d.reshape(nb, 1, H, W)                      # back to NCHW (C=1)
    return recon, mu, logvar


if __name__ == "__main__":
    key = jax.random.PRNGKey(0)
    kp, kx, ke = jax.random.split(key, 3)
    params = init_params(kp)

    batch = 2
    consts = preprocess_params(params, batch)

    x = jax.random.normal(kx, (batch, C_IN, H, W), dtype=jnp.float32)
    # TODO(synk): torch.randn_like noise is supplied externally for determinism.
    eps = jax.random.normal(ke, (batch, LATENT_DIM), dtype=jnp.float32)

    fwd = jax.jit(vae_forward)
    recon, mu, logvar = fwd(consts, x, eps)
    jax.block_until_ready((recon, mu, logvar))

    assert recon.shape == (batch, C_IN, H, W)
    assert mu.shape == (batch, LATENT_DIM) and logvar.shape == (batch, LATENT_DIM)
    assert bool(jnp.all(jnp.isfinite(recon)))
    assert bool(jnp.all(recon >= 0.0)) and bool(jnp.all(recon <= 1.0))
    print("KERNEL_OK")
</pallas_src>

<mosaic_0001>
module attributes {stable_mosaic.version = 11 : i64} {
  func.func @_vae_kernel(%arg0: memref<32x16xf32, #tpu.memory_space<vmem>>, %arg1: memref<2x8xf32, #tpu.memory_space<vmem>>, %arg2: memref<3x32x32xbf16, #tpu.memory_space<vmem>>, %arg3: memref<16x384xbf16, #tpu.memory_space<vmem>>, %arg4: memref<1x128xf32, #tpu.memory_space<vmem>>, %arg5: memref<3x16x32xbf16, #tpu.memory_space<vmem>>, %arg6: memref<128x192xbf16, #tpu.memory_space<vmem>>, %arg7: memref<1x64xf32, #tpu.memory_space<vmem>>, %arg8: memref<64x256xbf16, #tpu.memory_space<vmem>>, %arg9: memref<1x32xf32, #tpu.memory_space<vmem>>, %arg10: memref<8x2x16xbf16, #tpu.memory_space<vmem>>, %arg11: memref<32x16xbf16, #tpu.memory_space<vmem>>, %arg12: memref<1x16xf32, #tpu.memory_space<vmem>>, %arg13: memref<8x32xbf16, #tpu.memory_space<vmem>>, %arg14: memref<1x32xf32, #tpu.memory_space<vmem>>, %arg15: memref<32x512xbf16, #tpu.memory_space<vmem>>, %arg16: memref<1x512xf32, #tpu.memory_space<vmem>>, %arg17: memref<8x16x2xbf16, #tpu.memory_space<vmem>>, %arg18: memref<3x32x16xbf16, #tpu.memory_space<vmem>>, %arg19: memref<64x384xbf16, #tpu.memory_space<vmem>>, %arg20: memref<1x128xf32, #tpu.memory_space<vmem>>, %arg21: memref<3x32x32xbf16, #tpu.memory_space<vmem>>, %arg22: memref<128x48xbf16, #tpu.memory_space<vmem>>, %arg23: memref<1x16xf32, #tpu.memory_space<vmem>>, %arg24: memref<32x16xf32, #tpu.memory_space<vmem>>, %arg25: memref<2x8xf32, #tpu.memory_space<vmem>>, %arg26: memref<2x8xf32, #tpu.memory_space<vmem>>) attributes {dimension_semantics = [], scalar_prefetch = 0 : i64, scratch_operands = 0 : i64, tpu.core_type = #tpu.core_type<tc>} {
    %c0 = arith.constant 0 : index
    %c0_0 = arith.constant 0 : index
    %0 = vector.load %arg0[%c0, %c0_0] : memref<32x16xf32, #tpu.memory_space<vmem>>, vector<32x16xf32>
    %1 = arith.truncf %0 : vector<32x16xf32> to vector<32x16xbf16>
    %c0_1 = arith.constant 0 : index
    %c0_2 = arith.constant 0 : index
    %2 = vector.load %arg3[%c0_1, %c0_2] : memref<16x384xbf16, #tpu.memory_space<vmem>>, vector<16x384xbf16>
    %cst = arith.constant dense<0.000000e+00> : vector<32x384xf32>
    %3 = tpu.matmul %1, %2, %cst {dimension_numbers = #tpu.dot_dimension_numbers<[1], [0], [0], [1], [0, 0, 1, 1], [], []>} : vector<32x16xbf16>, vector<16x384xbf16>, vector<32x384xf32> -> vector<32x384xf32>
    %4 = arith.truncf %3 : vector<32x384xf32> to vector<32x384xbf16>
    %c0_3 = arith.constant 0 : index
    %c0_4 = arith.constant 0 : index
    %5 = vector.load %arg4[%c0_3, %c0_4] : memref<1x128xf32, #tpu.memory_space<vmem>>, vector<1x128xf32>
    %c0_5 = arith.constant 0 : index
    %c0_6 = arith.constant 0 : index
    %c0_7 = arith.constant 0 : index
    %6 = vector.load %arg2[%c0_5, %c0_6, %c0_7] : memref<3x32x32xbf16, #tpu.memory_space<vmem>>, vector<1x32x32xbf16>
    %7 = vector.shape_cast %6 : vector<1x32x32xbf16> to vector<32x32xbf16>
    %8 = vector.extract_strided_slice %4 {offsets = [0, 0], sizes = [32, 128], strides = [1, 1]} : vector<32x384xbf16> to vector<32x128xbf16>
    %cst_8 = arith.constant dense<0.000000e+00> : vector<32x128xf32>
    %9 = tpu.matmul %7, %8, %cst_8 {dimension_numbers = #tpu.dot_dimension_numbers<[1], [0], [0], [1], [0, 0, 1, 1], [], []>} : vector<32x32xbf16>, vector<32x128xbf16>, vector<32x128xf32> -> vector<32x128xf32>
    %10 = vector.broadcast %5 : vector<1x128xf32> to vector<32x128xf32>
    %11 = arith.addf %10, %9 : vector<32x128xf32>
    %c1 = arith.constant 1 : index
    %c0_9 = arith.constant 0 : index
    %c0_10 = arith.constant 0 : index
    %12 = vector.load %arg2[%c1, %c0_9, %c0_10] : memref<3x32x32xbf16, #tpu.memory_space<vmem>>, vector<1x32x32xbf16>
    %13 = vector.shape_cast %12 : vector<1x32x32xbf16> to vector<32x32xbf16>
    %14 = vector.extract_strided_slice %4 {offsets = [0, 128], sizes = [32, 128], strides = [1, 1]} : vector<32x384xbf16> to vector<32x128xbf16>
    %cst_11 = arith.constant dense<0.000000e+00> : vector<32x128xf32>
    %15 = tpu.matmul %13, %14, %cst_11 {dimension_numbers = #tpu.dot_dimension_numbers<[1], [0], [0], [1], [0, 0, 1, 1], [], []>} : vector<32x32xbf16>, vector<32x128xbf16>, vector<32x128xf32> -> vector<32x128xf32>
    %16 = arith.addf %11, %15 : vector<32x128xf32>
    %c2 = arith.constant 2 : index
    %c0_12 = arith.constant 0 : index
    %c0_13 = arith.constant 0 : index
    %17 = vector.load %arg2[%c2, %c0_12, %c0_13] : memref<3x32x32xbf16, #tpu.memory_space<vmem>>, vector<1x32x32xbf16>
    %18 = vector.shape_cast %17 : vector<1x32x32xbf16> to vector<32x32xbf16>
    %19 = vector.extract_strided_slice %4 {offsets = [0, 256], sizes = [32, 128], strides = [1, 1]} : vector<32x384xbf16> to vector<32x128xbf16>
    %cst_14 = arith.constant dense<0.000000e+00> : vector<32x128xf32>
    %20 = tpu.matmul %18, %19, %cst_14 {dimension_numbers = #tpu.dot_dimension_numbers<[1], [0], [0], [1], [0, 0, 1, 1], [], []>} : vector<32x32xbf16>, vector<32x128xbf16>, vector<32x128xf32> -> vector<32x128xf32>
    %21 = arith.addf %16, %20 : vector<32x128xf32>
    %cst_15 = arith.constant 0.000000e+00 : f32
    %22 = vector.broadcast %cst_15 : f32 to vector<32x128xf32>
    %23 = arith.maximumf %21, %22 : vector<32x128xf32>
    %24 = arith.truncf %23 : vector<32x128xf32> to vector<32x128xbf16>
    %c0_16 = arith.constant 0 : index
    %c0_17 = arith.constant 0 : index
    %25 = vector.load %arg6[%c0_16, %c0_17] : memref<128x192xbf16, #tpu.memory_space<vmem>>, vector<128x192xbf16>
    %cst_18 = arith.constant dense<0.000000e+00> : vector<32x192xf32>
    %26 = tpu.matmul %24, %25, %cst_18 {dimension_numbers = #tpu.dot_dimension_numbers<[1], [0], [0], [1], [0, 0, 1, 1], [], []>} : vector<32x128xbf16>, vector<128x192xbf16>, vector<32x192xf32> -> vector<32x192xf32>
    %27 = arith.truncf %26 : vector<32x192xf32> to vector<32x192xbf16>
    %c0_19 = arith.constant 0 : index
    %c0_20 = arith.constant 0 : index
    %28 = vector.load %arg7[%c0_19, %c0_20] : memref<1x64xf32, #tpu.memory_space<vmem>>, vector<1x64xf32>
    %c0_21 = arith.constant 0 : index
    %c0_22 = arith.constant 0 : index
    %c0_23 = arith.constant 0 : index
    %29 = vector.load %arg5[%c0_21, %c0_22, %c0_23] : memref<3x16x32xbf16, #tpu.memory_space<vmem>>, vector<1x16x32xbf16>
    %30 = vector.shape_cast %29 : vector<1x16x32xbf16> to vector<16x32xbf16>
    %31 = vector.extract_strided_slice %27 {offsets = [0, 0], sizes = [32, 64], strides = [1, 1]} : vector<32x192xbf16> to vector<32x64xbf16>
    %cst_24 = arith.constant dense<0.000000e+00> : vector<16x64xf32>
    %32 = tpu.matmul %30, %31, %cst_24 {dimension_numbers = #tpu.dot_dimension_numbers<[1], [0], [0], [1], [0, 0, 1, 1], [], []>} : vector<16x32xbf16>, vector<32x64xbf16>, vector<16x64xf32> -> vector<16x64xf32>
    %33 = vector.broadcast %28 : vector<1x64xf32> to vector<16x64xf32>
    %34 = arith.addf %33, %32 : vector<16x64xf32>
    %c1_25 = arith.constant 1 : index
    %c0_26 = arith.constant 0 : index
    %c0_27 = arith.constant 0 : index
    %35 = vector.load %arg5[%c1_25, %c0_26, %c0_27] : memref<3x16x32xbf16, #tpu.memory_space<vmem>>, vector<1x16x32xbf16>
    %36 = vector.shape_cast %35 : vector<1x16x32xbf16> to vector<16x32xbf16>
    %37 = vector.extract_strided_slice %27 {offsets = [0, 64], sizes = [32, 64], strides = [1, 1]} : vector<32x192xbf16> to vector<32x64xbf16>
    %cst_28 = arith.constant dense<0.000000e+00> : vector<16x64xf32>
    %38 = tpu.matmul %36, %37, %cst_28 {dimension_numbers = #tpu.dot_dimension_numbers<[1], [0], [0], [1], [0, 0, 1, 1], [], []>} : vector<16x32xbf16>, vector<32x64xbf16>, vector<16x64xf32> -> vector<16x64xf32>
    %39 = arith.addf %34, %38 : vector<16x64xf32>
    %c2_29 = arith.constant 2 : index
    %c0_30 = arith.constant 0 : index
    %c0_31 = arith.constant 0 : index
    %40 = vector.load %arg5[%c2_29, %c0_30, %c0_31] : memref<3x16x32xbf16, #tpu.memory_space<vmem>>, vector<1x16x32xbf16>
    %41 = vector.shape_cast %40 : vector<1x16x32xbf16> to vector<16x32xbf16>
    %42 = vector.extract_strided_slice %27 {offsets = [0, 128], sizes = [32, 64], strides = [1, 1]} : vector<32x192xbf16> to vector<32x64xbf16>
    %cst_32 = arith.constant dense<0.000000e+00> : vector<16x64xf32>
    %43 = tpu.matmul %41, %42, %cst_32 {dimension_numbers = #tpu.dot_dimension_numbers<[1], [0], [0], [1], [0, 0, 1, 1], [], []>} : vector<16x32xbf16>, vector<32x64xbf16>, vector<16x64xf32> -> vector<16x64xf32>
    %44 = arith.addf %39, %43 : vector<16x64xf32>
    %cst_33 = arith.constant 0.000000e+00 : f32
    %45 = vector.broadcast %cst_33 : f32 to vector<16x64xf32>
    %46 = arith.maximumf %44, %45 : vector<16x64xf32>
    %47 = arith.truncf %46 : vector<16x64xf32> to vector<16x64xbf16>
    %c0_34 = arith.constant 0 : index
    %c0_35 = arith.constant 0 : index
    %48 = vector.load %arg8[%c0_34, %c0_35] : memref<64x256xbf16, #tpu.memory_space<vmem>>, vector<64x256xbf16>
    %cst_36 = arith.constant dense<0.000000e+00> : vector<16x256xf32>
    %49 = tpu.matmul %47, %48, %cst_36 {dimension_numbers = #tpu.dot_dimension_numbers<[1], [0], [0], [1], [0, 0, 1, 1], [], []>} : vector<16x64xbf16>, vector<64x256xbf16>, vector<16x256xf32> -> vector<16x256xf32>
    %50 = arith.truncf %49 : vector<16x256xf32> to vector<16x256xbf16>
    %c0_37 = arith.constant 0 : index
    %c0_38 = arith.constant 0 : index
    %51 = vector.load %arg9[%c0_37, %c0_38] : memref<1x32xf32, #tpu.memory_space<vmem>>, vector<1x32xf32>
    %c0_39 = arith.constant 0 : index
    %c0_40 = arith.constant 0 : index
    %c0_41 = arith.constant 0 : index
    %52 = vector.load %arg10[%c0_39, %c0_40, %c0_41] : memref<8x2x16xbf16, #tpu.memory_space<vmem>>, vector<1x2x16xbf16>
    %53 = vector.shape_cast %52 : vector<1x2x16xbf16> to vector<2x16xbf16>
    %54 = vector.extract_strided_slice %50 {offsets = [0, 0], sizes = [16, 32], strides = [1, 1]} : vector<16x256xbf16> to vector<16x32xbf16>
    %cst_42 = arith.constant dense<0.000000e+00> : vector<2x32xf32>
    %55 = tpu.matmul %53, %54, %cst_42 {dimension_numbers = #tpu.dot_dimension_numbers<[1], [0], [0], [1], [0, 0, 1, 1], [], []>} : vector<2x16xbf16>, vector<16x32xbf16>, vector<2x32xf32> -> vector<2x32xf32>
    %56 = vector.broadcast %51 : vector<1x32xf32> to vector<2x32xf32>
    %57 = arith.addf %56, %55 : vector<2x32xf32>
    %c1_43 = arith.constant 1 : index
    %c0_44 = arith.constant 0 : index
    %c0_45 = arith.constant 0 : index
    %58 = vector.load %arg10[%c1_43, %c0_44, %c0_45] : memref<8x2x16xbf16, #tpu.memory_space<vmem>>, vector<1x2x16xbf16>
    %59 = vector.shape_cast %58 : vector<1x2x16xbf16> to vector<2x16xbf16>
    %60 = vector.extract_strided_slice %50 {offsets = [0, 32], sizes = [16, 32], strides = [1, 1]} : vector<16x256xbf16> to vector<16x32xbf16>
    %cst_46 = arith.constant dense<0.000000e+00> : vector<2x32xf32>
    %61 = tpu.matmul %59, %60, %cst_46 {dimension_numbers = #tpu.dot_dimension_numbers<[1], [0], [0], [1], [0, 0, 1, 1], [], []>} : vector<2x16xbf16>, vector<16x32xbf16>, vector<2x32xf32> -> vector<2x32xf32>
    %62 = arith.addf %57, %61 : vector<2x32xf32>
    %c2_47 = arith.constant 2 : index
    %c0_48 = arith.constant 0 : index
    %c0_49 = arith.constant 0 : index
    %63 = vector.load %arg10[%c2_47, %c0_48, %c0_49] : memref<8x2x16xbf16, #tpu.memory_space<vmem>>, vector<1x2x16xbf16>
    %64 = vector.shape_cast %63 : vector<1x2x16xbf16> to vector<2x16xbf16>
    %65 = vector.extract_strided_slice %50 {offsets = [0, 64], sizes = [16, 32], strides = [1, 1]} : vector<16x256xbf16> to vector<16x32xbf16>
    %cst_50 = arith.constant dense<0.000000e+00> : vector<2x32xf32>
    %66 = tpu.matmul %64, %65, %cst_50 {dimension_numbers = #tpu.dot_dimension_numbers<[1], [0], [0], [1], [0, 0, 1, 1], [], []>} : vector<2x16xbf16>, vector<16x32xbf16>, vector<2x32xf32> -> vector<2x32xf32>
    %67 = arith.addf %62, %66 : vector<2x32xf32>
    %c3 = arith.constant 3 : index
    %c0_51 = arith.constant 0 : index
    %c0_52 = arith.constant 0 : index
    %68 = vector.load %arg10[%c3, %c0_51, %c0_52] : memref<8x2x16xbf16, #tpu.memory_space<vmem>>, vector<1x2x16xbf16>
    %69 = vector.shape_cast %68 : vector<1x2x16xbf16> to vector<2x16xbf16>
    %70 = vector.extract_strided_slice %50 {offsets = [0, 96], sizes = [16, 32], strides = [1, 1]} : vector<16x256xbf16> to vector<16x32xbf16>
    %cst_53 = arith.constant dense<0.000000e+00> : vector<2x32xf32>
    %71 = tpu.matmul %69, %70, %cst_53 {dimension_numbers = #tpu.dot_dimension_numbers<[1], [0], [0], [1], [0, 0, 1, 1], [], []>} : vector<2x16xbf16>, vector<16x32xbf16>, vector<2x32xf32> -> vector<2x32xf32>
    %72 = arith.addf %67, %71 : vector<2x32xf32>
    %c4 = arith.constant 4 : index
    %c0_54 = arith.constant 0 : index
    %c0_55 = arith.constant 0 : index
    %73 = vector.load %arg10[%c4, %c0_54, %c0_55] : memref<8x2x16xbf16, #tpu.memory_space<vmem>>, vector<1x2x16xbf16>
    %74 = vector.shape_cast %73 : vector<1x2x16xbf16> to vector<2x16xbf16>
    %75 = vector.extract_strided_slice %50 {offsets = [0, 128], sizes = [16, 32], strides = [1, 1]} : vector<16x256xbf16> to vector<16x32xbf16>
    %cst_56 = arith.constant dense<0.000000e+00> : vector<2x32xf32>
    %76 = tpu.matmul %74, %75, %cst_56 {dimension_numbers = #tpu.dot_dimension_numbers<[1], [0], [0], [1], [0, 0, 1, 1], [], []>} : vector<2x16xbf16>, vector<16x32xbf16>, vector<2x32xf32> -> vector<2x32xf32>
    %77 = arith.addf %72, %76 : vector<2x32xf32>
    %c5 = arith.constant 5 : index
    %c0_57 = arith.constant 0 : index
    %c0_58 = arith.constant 0 : index
    %78 = vector.load %arg10[%c5, %c0_57, %c0_58] : memref<8x2x16xbf16, #tpu.memory_space<vmem>>, vector<1x2x16xbf16>
    %79 = vector.shape_cast %78 : vector<1x2x16xbf16> to vector<2x16xbf16>
    %80 = vector.extract_strided_slice %50 {offsets = [0, 160], sizes = [16, 32], strides = [1, 1]} : vector<16x256xbf16> to vector<16x32xbf16>
    %cst_59 = arith.constant dense<0.000000e+00> : vector<2x32xf32>
    %81 = tpu.matmul %79, %80, %cst_59 {dimension_numbers = #tpu.dot_dimension_numbers<[1], [0], [0], [1], [0, 0, 1, 1], [], []>} : vector<2x16xbf16>, vector<16x32xbf16>, vector<2x32xf32> -> vector<2x32xf32>
    %82 = arith.addf %77, %81 : vector<2x32xf32>
    %c6 = arith.constant 6 : index
    %c0_60 = arith.constant 0 : index
    %c0_61 = arith.constant 0 : index
    %83 = vector.load %arg10[%c6, %c0_60, %c0_61] : memref<8x2x16xbf16, #tpu.memory_space<vmem>>, vector<1x2x16xbf16>
    %84 = vector.shape_cast %83 : vector<1x2x16xbf16> to vector<2x16xbf16>
    %85 = vector.extract_strided_slice %50 {offsets = [0, 192], sizes = [16, 32], strides = [1, 1]} : vector<16x256xbf16> to vector<16x32xbf16>
    %cst_62 = arith.constant dense<0.000000e+00> : vector<2x32xf32>
    %86 = tpu.matmul %84, %85, %cst_62 {dimension_numbers = #tpu.dot_dimension_numbers<[1], [0], [0], [1], [0, 0, 1, 1], [], []>} : vector<2x16xbf16>, vector<16x32xbf16>, vector<2x32xf32> -> vector<2x32xf32>
    %87 = arith.addf %82, %86 : vector<2x32xf32>
    %c7 = arith.constant 7 : index
    %c0_63 = arith.constant 0 : index
    %c0_64 = arith.constant 0 : index
    %88 = vector.load %arg10[%c7, %c0_63, %c0_64] : memref<8x2x16xbf16, #tpu.memory_space<vmem>>, vector<1x2x16xbf16>
    %89 = vector.shape_cast %88 : vector<1x2x16xbf16> to vector<2x16xbf16>
    %90 = vector.extract_strided_slice %50 {offsets = [0, 224], sizes = [16, 32], strides = [1, 1]} : vector<16x256xbf16> to vector<16x32xbf16>
    %cst_65 = arith.constant dense<0.000000e+00> : vector<2x32xf32>
    %91 = tpu.matmul %89, %90, %cst_65 {dimension_numbers = #tpu.dot_dimension_numbers<[1], [0], [0], [1], [0, 0, 1, 1], [], []>} : vector<2x16xbf16>, vector<16x32xbf16>, vector<2x32xf32> -> vector<2x32xf32>
    %92 = arith.addf %87, %91 : vector<2x32xf32>
    %cst_66 = arith.constant 0.000000e+00 : f32
    %93 = vector.broadcast %cst_66 : f32 to vector<2x32xf32>
    %94 = arith.maximumf %92, %93 : vector<2x32xf32>
    %95 = arith.truncf %94 : vector<2x32xf32> to vector<2x32xbf16>
    %c0_67 = arith.constant 0 : index
    %c0_68 = arith.constant 0 : index
    %96 = vector.load %arg11[%c0_67, %c0_68] : memref<32x16xbf16, #tpu.memory_space<vmem>>, vector<32x16xbf16>
    %cst_69 = arith.constant dense<0.000000e+00> : vector<2x16xf32>
    %97 = tpu.matmul %95, %96, %cst_69 {dimension_numbers = #tpu.dot_dimension_numbers<[1], [0], [0], [1], [0, 0, 1, 1], [], []>} : vector<2x32xbf16>, vector<32x16xbf16>, vector<2x16xf32> -> vector<2x16xf32>
    %c0_70 = arith.constant 0 : index
    %c0_71 = arith.constant 0 : index
    %98 = vector.load %arg12[%c0_70, %c0_71] : memref<1x16xf32, #tpu.memory_space<vmem>>, vector<1x16xf32>
    %99 = vector.broadcast %98 : vector<1x16xf32> to vector<2x16xf32>
    %100 = arith.addf %97, %99 : vector<2x16xf32>
    %101 = vector.extract_strided_slice %100 {offsets = [0, 0], sizes = [2, 8], strides = [1, 1]} : vector<2x16xf32> to vector<2x8xf32>
    %102 = vector.extract_strided_slice %100 {offsets = [0, 8], sizes = [2, 8], strides = [1, 1]} : vector<2x16xf32> to vector<2x8xf32>
    %c0_72 = arith.constant 0 : index
    %c0_73 = arith.constant 0 : index
    %103 = vector.load %arg25[%c0_72, %c0_73] : memref<2x8xf32, #tpu.memory_space<vmem>>, vector<2x8xf32>
    tpu.vector_store %arg25[%c0_72, %c0_73], %101 {strides = array<i32>} : memref<2x8xf32, #tpu.memory_space<vmem>>, vector<2x8xf32>,
    %c0_74 = arith.constant 0 : index
    %c0_75 = arith.constant 0 : index
    %104 = vector.load %arg26[%c0_74, %c0_75] : memref<2x8xf32, #tpu.memory_space<vmem>>, vector<2x8xf32>
    tpu.vector_store %arg26[%c0_74, %c0_75], %102 {strides = array<i32>} : memref<2x8xf32, #tpu.memory_space<vmem>>, vector<2x8xf32>,
    %c0_76 = arith.constant 0 : index
    %c0_77 = arith.constant 0 : index
    %105 = vector.load %arg1[%c0_76, %c0_77] : memref<2x8xf32, #tpu.memory_space<vmem>>, vector<2x8xf32>
    %cst_78 = arith.constant 5.000000e-01 : f32
    %106 = vector.broadcast %cst_78 : f32 to vector<2x8xf32>
    %107 = arith.mulf %106, %102 : vector<2x8xf32>
    %108 = math.exp %107 : vector<2x8xf32>
    %109 = arith.mulf %105, %108 : vector<2x8xf32>
    %110 = arith.addf %101, %109 : vector<2x8xf32>
    %111 = arith.truncf %110 : vector<2x8xf32> to vector<2x8xbf16>
    %c0_79 = arith.constant 0 : index
    %c0_80 = arith.constant 0 : index
    %112 = vector.load %arg13[%c0_79, %c0_80] : memref<8x32xbf16, #tpu.memory_space<vmem>>, vector<8x32xbf16>
    %cst_81 = arith.constant dense<0.000000e+00> : vector<2x32xf32>
    %113 = tpu.matmul %111, %112, %cst_81 {dimension_numbers = #tpu.dot_dimension_numbers<[1], [0], [0], [1], [0, 0, 1, 1], [], []>} : vector<2x8xbf16>, vector<8x32xbf16>, vector<2x32xf32> -> vector<2x32xf32>
    %c0_82 = arith.constant 0 : index
    %c0_83 = arith.constant 0 : index
    %114 = vector.load %arg14[%c0_82, %c0_83] : memref<1x32xf32, #tpu.memory_space<vmem>>, vector<1x32xf32>
    %115 = vector.broadcast %114 : vector<1x32xf32> to vector<2x32xf32>
    %116 = arith.addf %113, %115 : vector<2x32xf32>
    %cst_84 = arith.constant 0.000000e+00 : f32
    %117 = vector.broadcast %cst_84 : f32 to vector<2x32xf32>
    %118 = arith.maximumf %116, %117 : vector<2x32xf32>
    %119 = arith.truncf %118 : vector<2x32xf32> to vector<2x32xbf16>
    %c0_85 = arith.constant 0 : index
    %c0_86 = arith.constant 0 : index
    %120 = vector.load %arg15[%c0_85, %c0_86] : memref<32x512xbf16, #tpu.memory_space<vmem>>, vector<32x512xbf16>
    %cst_87 = arith.constant dense<0.000000e+00> : vector<2x512xf32>
    %121 = tpu.matmul %119, %120, %cst_87 {dimension_numbers = #tpu.dot_dimension_numbers<[1], [0], [0], [1], [0, 0, 1, 1], [], []>} : vector<2x32xbf16>, vector<32x512xbf16>, vector<2x512xf32> -> vector<2x512xf32>
    %c0_88 = arith.constant 0 : index
    %c0_89 = arith.constant 0 : index
    %122 = vector.load %arg16[%c0_88, %c0_89] : memref<1x512xf32, #tpu.memory_space<vmem>>, vector<1x512xf32>
    %123 = vector.broadcast %122 : vector<1x512xf32> to vector<2x512xf32>
    %124 = arith.addf %121, %123 : vector<2x512xf32>
    %cst_90 = arith.constant 0.000000e+00 : f32
    %125 = vector.broadcast %cst_90 : f32 to vector<2x512xf32>
    %126 = arith.maximumf %124, %125 : vector<2x512xf32>
    %127 = arith.truncf %126 : vector<2x512xf32> to vector<2x512xbf16>
    %c0_91 = arith.constant 0 : index
    %c0_92 = arith.constant 0 : index
    %c0_93 = arith.constant 0 : index
    %128 = vector.load %arg17[%c0_91, %c0_92, %c0_93] : memref<8x16x2xbf16, #tpu.memory_space<vmem>>, vector<1x16x2xbf16>
    %129 = vector.shape_cast %128 : vector<1x16x2xbf16> to vector<16x2xbf16>
    %130 = vector.extract_strided_slice %127 {offsets = [0, 0], sizes = [2, 64], strides = [1, 1]} : vector<2x512xbf16> to vector<2x64xbf16>
    %cst_94 = arith.constant dense<0.000000e+00> : vector<16x64xf32>
    %131 = tpu.matmul %129, %130, %cst_94 {dimension_numbers = #tpu.dot_dimension_numbers<[1], [0], [0], [1], [0, 0, 1, 1], [], []>} : vector<16x2xbf16>, vector<2x64xbf16>, vector<16x64xf32> -> vector<16x64xf32>
    %c1_95 = arith.constant 1 : index
    %c0_96 = arith.constant 0 : index
    %c0_97 = arith.constant 0 : index
    %132 = vector.load %arg17[%c1_95, %c0_96, %c0_97] : memref<8x16x2xbf16, #tpu.memory_space<vmem>>, vector<1x16x2xbf16>
    %133 = vector.shape_cast %132 : vector<1x16x2xbf16> to vector<16x2xbf16>
    %134 = vector.extract_strided_slice %127 {offsets = [0, 64], sizes = [2, 64], strides = [1, 1]} : vector<2x512xbf16> to vector<2x64xbf16>
    %cst_98 = arith.constant dense<0.000000e+00> : vector<16x64xf32>
    %135 = tpu.matmul %133, %134, %cst_98 {dimension_numbers = #tpu.dot_dimension_numbers<[1], [0], [0], [1], [0, 0, 1, 1], [], []>} : vector<16x2xbf16>, vector<2x64xbf16>, vector<16x64xf32> -> vector<16x64xf32>
    %136 = arith.addf %131, %135 : vector<16x64xf32>
    %c2_99 = arith.constant 2 : index
    %c0_100 = arith.constant 0 : index
    %c0_101 = arith.constant 0 : index
    %137 = vector.load %arg17[%c2_99, %c0_100, %c0_101] : memref<8x16x2xbf16, #tpu.memory_space<vmem>>, vector<1x16x2xbf16>
    %138 = vector.shape_cast %137 : vector<1x16x2xbf16> to vector<16x2xbf16>
    %139 = vector.extract_strided_slice %127 {offsets = [0, 128], sizes = [2, 64], strides = [1, 1]} : vector<2x512xbf16> to vector<2x64xbf16>
    %cst_102 = arith.constant dense<0.000000e+00> : vector<16x64xf32>
    %140 = tpu.matmul %138, %139, %cst_102 {dimension_numbers = #tpu.dot_dimension_numbers<[1], [0], [0], [1], [0, 0, 1, 1], [], []>} : vector<16x2xbf16>, vector<2x64xbf16>, vector<16x64xf32> -> vector<16x64xf32>
    %141 = arith.addf %136, %140 : vector<16x64xf32>
    %c3_103 = arith.constant 3 : index
    %c0_104 = arith.constant 0 : index
    %c0_105 = arith.constant 0 : index
    %142 = vector.load %arg17[%c3_103, %c0_104, %c0_105] : memref<8x16x2xbf16, #tpu.memory_space<vmem>>, vector<1x16x2xbf16>
    %143 = vector.shape_cast %142 : vector<1x16x2xbf16> to vector<16x2xbf16>
    %144 = vector.extract_strided_slice %127 {offsets = [0, 192], sizes = [2, 64], strides = [1, 1]} : vector<2x512xbf16> to vector<2x64xbf16>
    %cst_106 = arith.constant dense<0.000000e+00> : vector<16x64xf32>
    %145 = tpu.matmul %143, %144, %cst_106 {dimension_numbers = #tpu.dot_dimension_numbers<[1], [0], [0], [1], [0, 0, 1, 1], [], []>} : vector<16x2xbf16>, vector<2x64xbf16>, vector<16x64xf32> -> vector<16x64xf32>
    %146 = arith.addf %141, %145 : vector<16x64xf32>
    %c4_107 = arith.constant 4 : index
    %c0_108 = arith.constant 0 : index
    %c0_109 = arith.constant 0 : index
    %147 = vector.load %arg17[%c4_107, %c0_108, %c0_109] : memref<8x16x2xbf16, #tpu.memory_space<vmem>>, vector<1x16x2xbf16>
    %148 = vector.shape_cast %147 : vector<1x16x2xbf16> to vector<16x2xbf16>
    %149 = vector.extract_strided_slice %127 {offsets = [0, 256], sizes = [2, 64], strides = [1, 1]} : vector<2x512xbf16> to vector<2x64xbf16>
    %cst_110 = arith.constant dense<0.000000e+00> : vector<16x64xf32>
    %150 = tpu.matmul %148, %149, %cst_110 {dimension_numbers = #tpu.dot_dimension_numbers<[1], [0], [0], [1], [0, 0, 1, 1], [], []>} : vector<16x2xbf16>, vector<2x64xbf16>, vector<16x64xf32> -> vector<16x64xf32>
    %151 = arith.addf %146, %150 : vector<16x64xf32>
    %c5_111 = arith.constant 5 : index
    %c0_112 = arith.constant 0 : index
    %c0_113 = arith.constant 0 : index
    %152 = vector.load %arg17[%c5_111, %c0_112, %c0_113] : memref<8x16x2xbf16, #tpu.memory_space<vmem>>, vector<1x16x2xbf16>
    %153 = vector.shape_cast %152 : vector<1x16x2xbf16> to vector<16x2xbf16>
    %154 = vector.extract_strided_slice %127 {offsets = [0, 320], sizes = [2, 64], strides = [1, 1]} : vector<2x512xbf16> to vector<2x64xbf16>
    %cst_114 = arith.constant dense<0.000000e+00> : vector<16x64xf32>
    %155 = tpu.matmul %153, %154, %cst_114 {dimension_numbers = #tpu.dot_dimension_numbers<[1], [0], [0], [1], [0, 0, 1, 1], [], []>} : vector<16x2xbf16>, vector<2x64xbf16>, vector<16x64xf32> -> vector<16x64xf32>
    %156 = arith.addf %151, %155 : vector<16x64xf32>
    %c6_115 = arith.constant 6 : index
    %c0_116 = arith.constant 0 : index
    %c0_117 = arith.constant 0 : index
    %157 = vector.load %arg17[%c6_115, %c0_116, %c0_117] : memref<8x16x2xbf16, #tpu.memory_space<vmem>>, vector<1x16x2xbf16>
    %158 = vector.shape_cast %157 : vector<1x16x2xbf16> to vector<16x2xbf16>
    %159 = vector.extract_strided_slice %127 {offsets = [0, 384], sizes = [2, 64], strides = [1, 1]} : vector<2x512xbf16> to vector<2x64xbf16>
    %cst_118 = arith.constant dense<0.000000e+00> : vector<16x64xf32>
    %160 = tpu.matmul %158, %159, %cst_118 {dimension_numbers = #tpu.dot_dimension_numbers<[1], [0], [0], [1], [0, 0, 1, 1], [], []>} : vector<16x2xbf16>, vector<2x64xbf16>, vector<16x64xf32> -> vector<16x64xf32>
    %161 = arith.addf %156, %160 : vector<16x64xf32>
    %c7_119 = arith.constant 7 : index
    %c0_120 = arith.constant 0 : index
    %c0_121 = arith.constant 0 : index
    %162 = vector.load %arg17[%c7_119, %c0_120, %c0_121] : memref<8x16x2xbf16, #tpu.memory_space<vmem>>, vector<1x16x2xbf16>
    %163 = vector.shape_cast %162 : vector<1x16x2xbf16> to vector<16x2xbf16>
    %164 = vector.extract_strided_slice %127 {offsets = [0, 448], sizes = [2, 64], strides = [1, 1]} : vector<2x512xbf16> to vector<2x64xbf16>
    %cst_122 = arith.constant dense<0.000000e+00> : vector<16x64xf32>
    %165 = tpu.matmul %163, %164, %cst_122 {dimension_numbers = #tpu.dot_dimension_numbers<[1], [0], [0], [1], [0, 0, 1, 1], [], []>} : vector<16x2xbf16>, vector<2x64xbf16>, vector<16x64xf32> -> vector<16x64xf32>
    %166 = arith.addf %161, %165 : vector<16x64xf32>
    %167 = arith.truncf %166 : vector<16x64xf32> to vector<16x64xbf16>
    %c0_123 = arith.constant 0 : index
    %c0_124 = arith.constant 0 : index
    %168 = vector.load %arg19[%c0_123, %c0_124] : memref<64x384xbf16, #tpu.memory_space<vmem>>, vector<64x384xbf16>
    %cst_125 = arith.constant dense<0.000000e+00> : vector<16x384xf32>
    %169 = tpu.matmul %167, %168, %cst_125 {dimension_numbers = #tpu.dot_dimension_numbers<[1], [0], [0], [1], [0, 0, 1, 1], [], []>} : vector<16x64xbf16>, vector<64x384xbf16>, vector<16x384xf32> -> vector<16x384xf32>
    %170 = arith.truncf %169 : vector<16x384xf32> to vector<16x384xbf16>
    %c0_126 = arith.constant 0 : index
    %c0_127 = arith.constant 0 : index
    %171 = vector.load %arg20[%c0_126, %c0_127] : memref<1x128xf32, #tpu.memory_space<vmem>>, vector<1x128xf32>
    %c0_128 = arith.constant 0 : index
    %c0_129 = arith.constant 0 : index
    %c0_130 = arith.constant 0 : index
    %172 = vector.load %arg18[%c0_128, %c0_129, %c0_130] : memref<3x32x16xbf16, #tpu.memory_space<vmem>>, vector<1x32x16xbf16>
    %173 = vector.shape_cast %172 : vector<1x32x16xbf16> to vector<32x16xbf16>
    %174 = vector.extract_strided_slice %170 {offsets = [0, 0], sizes = [16, 128], strides = [1, 1]} : vector<16x384xbf16> to vector<16x128xbf16>
    %cst_131 = arith.constant dense<0.000000e+00> : vector<32x128xf32>
    %175 = tpu.matmul %173, %174, %cst_131 {dimension_numbers = #tpu.dot_dimension_numbers<[1], [0], [0], [1], [0, 0, 1, 1], [], []>} : vector<32x16xbf16>, vector<16x128xbf16>, vector<32x128xf32> -> vector<32x128xf32>
    %176 = vector.broadcast %171 : vector<1x128xf32> to vector<32x128xf32>
    %177 = arith.addf %176, %175 : vector<32x128xf32>
    %c1_132 = arith.constant 1 : index
    %c0_133 = arith.constant 0 : index
    %c0_134 = arith.constant 0 : index
    %178 = vector.load %arg18[%c1_132, %c0_133, %c0_134] : memref<3x32x16xbf16, #tpu.memory_space<vmem>>, vector<1x32x16xbf16>
    %179 = vector.shape_cast %178 : vector<1x32x16xbf16> to vector<32x16xbf16>
    %180 = vector.extract_strided_slice %170 {offsets = [0, 128], sizes = [16, 128], strides = [1, 1]} : vector<16x384xbf16> to vector<16x128xbf16>
    %cst_135 = arith.constant dense<0.000000e+00> : vector<32x128xf32>
    %181 = tpu.matmul %179, %180, %cst_135 {dimension_numbers = #tpu.dot_dimension_numbers<[1], [0], [0], [1], [0, 0, 1, 1], [], []>} : vector<32x16xbf16>, vector<16x128xbf16>, vector<32x128xf32> -> vector<32x128xf32>
    %182 = arith.addf %177, %181 : vector<32x128xf32>
    %c2_136 = arith.constant 2 : index
    %c0_137 = arith.constant 0 : index
    %c0_138 = arith.constant 0 : index
    %183 = vector.load %arg18[%c2_136, %c0_137, %c0_138] : memref<3x32x16xbf16, #tpu.memory_space<vmem>>, vector<1x32x16xbf16>
    %184 = vector.shape_cast %183 : vector<1x32x16xbf16> to vector<32x16xbf16>
    %185 = vector.extract_strided_slice %170 {offsets = [0, 256], sizes = [16, 128], strides = [1, 1]} : vector<16x384xbf16> to vector<16x128xbf16>
    %cst_139 = arith.constant dense<0.000000e+00> : vector<32x128xf32>
    %186 = tpu.matmul %184, %185, %cst_139 {dimension_numbers = #tpu.dot_dimension_numbers<[1], [0], [0], [1], [0, 0, 1, 1], [], []>} : vector<32x16xbf16>, vector<16x128xbf16>, vector<32x128xf32> -> vector<32x128xf32>
    %187 = arith.addf %182, %186 : vector<32x128xf32>
    %cst_140 = arith.constant 0.000000e+00 : f32
    %188 = vector.broadcast %cst_140 : f32 to vector<32x128xf32>
    %189 = arith.maximumf %187, %188 : vector<32x128xf32>
    %190 = arith.truncf %189 : vector<32x128xf32> to vector<32x128xbf16>
    %c0_141 = arith.constant 0 : index
    %c0_142 = arith.constant 0 : index
    %191 = vector.load %arg22[%c0_141, %c0_142] : memref<128x48xbf16, #tpu.memory_space<vmem>>, vector<128x48xbf16>
    %cst_143 = arith.constant dense<0.000000e+00> : vector<32x48xf32>
    %192 = tpu.matmul %190, %191, %cst_143 {dimension_numbers = #tpu.dot_dimension_numbers<[1], [0], [0], [1], [0, 0, 1, 1], [], []>} : vector<32x128xbf16>, vector<128x48xbf16>, vector<32x48xf32> -> vector<32x48xf32>
    %193 = arith.truncf %192 : vector<32x48xf32> to vector<32x48xbf16>
    %c0_144 = arith.constant 0 : index
    %c0_145 = arith.constant 0 : index
    %194 = vector.load %arg23[%c0_144, %c0_145] : memref<1x16xf32, #tpu.memory_space<vmem>>, vector<1x16xf32>
    %c0_146 = arith.constant 0 : index
    %c0_147 = arith.constant 0 : index
    %c0_148 = arith.constant 0 : index
    %195 = vector.load %arg21[%c0_146, %c0_147, %c0_148] : memref<3x32x32xbf16, #tpu.memory_space<vmem>>, vector<1x32x32xbf16>
    %196 = vector.shape_cast %195 : vector<1x32x32xbf16> to vector<32x32xbf16>
    %197 = vector.extract_strided_slice %193 {offsets = [0, 0], sizes = [32, 16], strides = [1, 1]} : vector<32x48xbf16> to vector<32x16xbf16>
    %cst_149 = arith.constant dense<0.000000e+00> : vector<32x16xf32>
    %198 = tpu.matmul %196, %197, %cst_149 {dimension_numbers = #tpu.dot_dimension_numbers<[1], [0], [0], [1], [0, 0, 1, 1], [], []>} : vector<32x32xbf16>, vector<32x16xbf16>, vector<32x16xf32> -> vector<32x16xf32>
    %199 = vector.broadcast %194 : vector<1x16xf32> to vector<32x16xf32>
    %200 = arith.addf %199, %198 : vector<32x16xf32>
    %c1_150 = arith.constant 1 : index
    %c0_151 = arith.constant 0 : index
    %c0_152 = arith.constant 0 : index
    %201 = vector.load %arg21[%c1_150, %c0_151, %c0_152] : memref<3x32x32xbf16, #tpu.memory_space<vmem>>, vector<1x32x32xbf16>
    %202 = vector.shape_cast %201 : vector<1x32x32xbf16> to vector<32x32xbf16>
    %203 = vector.extract_strided_slice %193 {offsets = [0, 16], sizes = [32, 16], strides = [1, 1]} : vector<32x48xbf16> to vector<32x16xbf16>
    %cst_153 = arith.constant dense<0.000000e+00> : vector<32x16xf32>
    %204 = tpu.matmul %202, %203, %cst_153 {dimension_numbers = #tpu.dot_dimension_numbers<[1], [0], [0], [1], [0, 0, 1, 1], [], []>} : vector<32x32xbf16>, vector<32x16xbf16>, vector<32x16xf32> -> vector<32x16xf32>
    %205 = arith.addf %200, %204 : vector<32x16xf32>
    %c2_154 = arith.constant 2 : index
    %c0_155 = arith.constant 0 : index
    %c0_156 = arith.constant 0 : index
    %206 = vector.load %arg21[%c2_154, %c0_155, %c0_156] : memref<3x32x32xbf16, #tpu.memory_space<vmem>>, vector<1x32x32xbf16>
    %207 = vector.shape_cast %206 : vector<1x32x32xbf16> to vector<32x32xbf16>
    %208 = vector.extract_strided_slice %193 {offsets = [0, 32], sizes = [32, 16], strides = [1, 1]} : vector<32x48xbf16> to vector<32x16xbf16>
    %cst_157 = arith.constant dense<0.000000e+00> : vector<32x16xf32>
    %209 = tpu.matmul %207, %208, %cst_157 {dimension_numbers = #tpu.dot_dimension_numbers<[1], [0], [0], [1], [0, 0, 1, 1], [], []>} : vector<32x32xbf16>, vector<32x16xbf16>, vector<32x16xf32> -> vector<32x16xf32>
    %210 = arith.addf %205, %209 : vector<32x16xf32>
    %211 = arith.negf %210 : vector<32x16xf32>
    %212 = math.exp %211 : vector<32x16xf32>
    %cst_158 = arith.constant 1.000000e+00 : f32
    %213 = vector.broadcast %cst_158 : f32 to vector<32x16xf32>
    %214 = arith.addf %213, %212 : vector<32x16xf32>
    %215 = arith.divf %213, %214 : vector<32x16xf32>
    %c0_159 = arith.constant 0 : index
    %c0_160 = arith.constant 0 : index
    %216 = vector.load %arg24[%c0_159, %c0_160] : memref<32x16xf32, #tpu.memory_space<vmem>>, vector<32x16xf32>
    tpu.vector_store %arg24[%c0_159, %c0_160], %215 {strides = array<i32>} : memref<32x16xf32, #tpu.memory_space<vmem>>, vector<32x16xf32>,
    return
  }
}

</mosaic_0001>

<bundles_post_ra>
// kernel: vae_forward.1
= control target key start
LH: loop header
LB: loop body
LE: loop exit
PB: predicated region body
PF: predicated region fallthrough
CT: control target
= control target key end

     0   :  { %s4766_s0 = inlined_call_operand.vmem [shape: f32[32,16], index: 0, kind: input, shape index: {}]   ;;  %s4767_s1 = inlined_call_operand.vmem [shape: f32[2,8], index: 1, kind: input, shape index: {}]   ;;  %s4768_s2 = inlined_call_operand.vmem [shape: bf16[3,32,32], index: 2, kind: input, shape index: {}]   ;;  %s4769_s3 = inlined_call_operand.vmem [shape: bf16[16,384], index: 3, kind: input, shape index: {}]   ;;  %s4770_s4 = inlined_call_operand.hbm [shape: f32[1,128], index: 4, kind: input, shape index: {}]   ;;  %s4771_s5 = inlined_call_operand.vmem [shape: bf16[3,16,32], index: 5, kind: input, shape index: {}]   ;;  %s4772_s6 = inlined_call_operand.vmem [shape: bf16[128,192], index: 6, kind: input, shape index: {}]   ;;  %s4773_s7 = inlined_call_operand.hbm [shape: f32[1,64], index: 7, kind: input, shape index: {}]   ;;  %s4774_s8 = inlined_call_operand.vmem [shape: bf16[64,256], index: 8, kind: input, shape index: {}]   ;;  %s4775_s9 = inlined_call_operand.hbm [shape: f32[1,32], index: 9, kind: input, shape index: {}]   ;;  %s4776_s10 = inlined_call_operand.vmem [shape: bf16[8,2,16], index: 10, kind: input, shape index: {}]   ;;  %s4777_s11 = inlined_call_operand.vmem [shape: bf16[32,16], index: 11, kind: input, shape index: {}]   ;;  %s4778_s12 = inlined_call_operand.hbm [shape: f32[1,16], index: 12, kind: input, shape index: {}]   ;;  %s4779_s13 = inlined_call_operand.vmem [shape: bf16[8,32], index: 13, kind: input, shape index: {}]   ;;  %s4780_s14 = inlined_call_operand.hbm [shape: f32[1,32], index: 14, kind: input, shape index: {}]   ;;  %s4781_s15 = inlined_call_operand.vmem [shape: bf16[32,512], index: 15, kind: input, shape index: {}]   ;;  %s4782_s16 = inlined_call_operand.hbm [shape: f32[1,512], index: 16, kind: input, shape index: {}]   ;;  %s4783_s17 = inlined_call_operand.vmem [shape: bf16[8,16,2], index: 17, kind: input, shape index: {}]   ;;  %s4784_s18 = inlined_call_operand.vmem [shape: bf16[3,32,16], index: 18, kind: input, shape index: {}]   ;;  %s4785_s19 = inlined_call_operand.vmem [shape: bf16[64,384], index: 19, kind: input, shape index: {}]   ;;  %s4786_s20 = inlined_call_operand.hbm [shape: f32[1,128], index: 20, kind: input, shape index: {}]   ;;  %s4787_s21 = inlined_call_operand.vmem [shape: bf16[3,32,32], index: 21, kind: input, shape index: {}]   ;;  %s4788_s22 = inlined_call_operand.vmem [shape: bf16[128,48], index: 22, kind: input, shape index: {}]   ;;  %s4789_s23 = inlined_call_operand.hbm [shape: f32[1,16], index: 23, kind: input, shape index: {}]   ;;  %s4790_s24 = inlined_call_operand.hbm [shape: f32[32,16], index: 24, kind: output, shape index: {0}]   ;;  %s4791_s25 = inlined_call_operand.hbm [shape: f32[2,8], index: 25, kind: output, shape index: {1}]   ;;  %s4792_s26 = inlined_call_operand.hbm [shape: f32[2,8], index: 26, kind: output, shape index: {2}]  }
   0x1   :  { %4803 = sst [smem:[#allocation27_spill]] %s4766_s0 }
   0x2   :  { %4804 = sst [smem:[#allocation28_spill]] %s4767_s1 }
   0x3   :  { %4805 = sst [smem:[#allocation29_spill]] %s4768_s2 }
   0x4   :  { %4806 = sst [smem:[#allocation30_spill]] %s4769_s3 }
   0x5   :  { %4807 = sst [smem:[#allocation31_spill]] %s4770_s4 }
   0x6   :  { %4808 = sst [smem:[#allocation32_spill]] %s4771_s5 }
   0x7   :  { %4809 = sst [smem:[#allocation33_spill]] %s4772_s6 }
   0x8   :  { %4810 = sst [smem:[#allocation34_spill]] %s4773_s7 }
   0x9   :  { %4811 = sst [smem:[#allocation35_spill]] %s4774_s8 }
   0xa   :  { %4812 = sst [smem:[#allocation36_spill]] %s4775_s9 }
   0xb   :  { %4813 = sst [smem:[#allocation37_spill]] %s4776_s10 }
   0xc   :  { %32 = vsyncpa [#allocation3], 0 }
   0xd   :  { %33 = vsyncpa [#allocation6], 0 }
   0xe   :  { %34 = vsyncpa [#allocation9], 0 }
   0xf   :  { %35 = vsyncpa [#allocation12], 0 }
  0x10   :  { %36 = vsyncpa [#allocation15], 0 }
  0x11   :  { %37 = vsyncpa [#allocation4], 0 }
  0x12   :  { %38 = vsyncpa [#allocation18], 0  ;;  %s4016_s27 = smov [#allocation5]   ;;  %s4017_s7 = smov [#allocation8]  }
  0x13   :  { %s67_s3 = sshll.u32 %s4016_s27, 4  ;;  %s93_s28 = sshll.u32 %s4017_s7, 4  ;;  %s68_s3 = int_to_ptr.vmem [resolvable:$true] %s67_s3  ;;  %s94_s28 = int_to_ptr.vmem [resolvable:$true] %s93_s28 }
  0x14   :  { %s4814_s29 = sld [smem:[#allocation34_spill]] }
  0x1a   :  { %s3760_s0 = scalar_lea.hbm %s4814_s29, 16 }
  0x1b   :  { %p3761_p0 = scmp.ne.s32.totalorder %s4814_s29, %s3760_s0  ;;  %p3764_p1 = scmp.lt.u32.totalorder %s3760_s0, %s4814_s29 }
  0x1d   :  { %p3766_p2 = pnand %p3764_p1, %p3761_p0 }
  0x1f   :  { %3769 = shalt.err (!%p3766_p2)
}
  0x20   :  { %s3770_s10 = scalar_lea.vmem %s68_s3, 16  ;;  %s3774_s6 = scalar_lea.vmem %s68_s3, 32 }
  0x21   :  { %p3771_p3 = scmp.ne.s32.totalorder %s68_s3, %s3770_s10  ;;  %p3775_p4 = scmp.lt.s32.totalorder %s68_s3, %s68_s3 }
  0x22   :  { %p3776_p5 = scmp.lt.s32.totalorder %s3774_s6, %s3770_s10 }
  0x24   :  { %p3777_p6 = por %p3776_p5, %p3775_p4 }
  0x26   :  { %p3778_p7 = pnand %p3777_p6, %p3771_p3 }
  0x28   :  { %3781 = shalt.err (!%p3778_p7)
}
  0x29   :  { %70 = dma.hbm_to_vmem [thread:$0]  %s4814_s29, 16, %s68_s3, [#allocation6]  }
  0x2a   :  { %s3782_s4 = scalar_lea.hbm %s4778_s12, 16 }
  0x2b   :  { %p3783_p8 = scmp.ne.s32.totalorder %s4778_s12, %s3782_s4  ;;  %p3786_p9 = scmp.lt.u32.totalorder %s3782_s4, %s4778_s12 }
  0x2d   :  { %p3788_p10 = pnand %p3786_p9, %p3783_p8 }
  0x2f   :  { %3791 = shalt.err (!%p3788_p10)
}
  0x30   :  { %s3792_s5 = scalar_lea.vmem %s94_s28, 16  ;;  %s3796_s10 = scalar_lea.vmem %s94_s28, 32 }
  0x31   :  { %p3793_p11 = scmp.ne.s32.totalorder %s94_s28, %s3792_s5  ;;  %p3797_p12 = scmp.lt.s32.totalorder %s94_s28, %s94_s28 }
  0x32   :  { %p3798_p13 = scmp.lt.s32.totalorder %s3796_s10, %s3792_s5 }
  0x34   :  { %p3799_p0 = por %p3798_p13, %p3797_p12 }
  0x36   :  { %p3800_p1 = pnand %p3799_p0, %p3793_p11 }
  0x38   :  { %3803 = shalt.err (!%p3800_p1)
}
  0x39   :  { %96 = dma.hbm_to_vmem [thread:$0]  %s4778_s12, 16, %s94_s28, [#allocation9]  }
  0x3a   :  { %s4018_s6 = smov [#allocation11]   ;;  %s4019_s27 = smov [#allocation2]  }
  0x3b   :  { %s117_s1 = sshll.u32 %s4018_s6, 4  ;;  %s53_s7 = sshll.u32 %s4019_s27, 4  ;;  %s118_s1 = int_to_ptr.vmem [resolvable:$true] %s117_s1  ;;  %s54_s7 = int_to_ptr.vmem [resolvable:$true] %s53_s7 }
  0x3c   :  { %s3804_s9 = scalar_lea.hbm %s4782_s16, 64 }
  0x3d   :  { %p3805_p2 = scmp.ne.s32.totalorder %s4782_s16, %s3804_s9  ;;  %p3808_p3 = scmp.lt.u32.totalorder %s3804_s9, %s4782_s16 }
  0x3f   :  { %p3810_p4 = pnand %p3808_p3, %p3805_p2 }
  0x41   :  { %3813 = shalt.err (!%p3810_p4)
}
  0x42   :  { %s3814_s12 = scalar_lea.vmem %s118_s1, 64  ;;  %p3819_p6 = scmp.lt.s32.totalorder %s118_s1, %s118_s1 }
  0x43   :  { %p3815_p5 = scmp.ne.s32.totalorder %s118_s1, %s3814_s12  ;;  %p3820_p7 = scmp.lt.s32.totalorder %s3814_s12, %s3814_s12 }
  0x45   :  { %p3821_p8 = por %p3820_p7, %p3819_p6 }
  0x47   :  { %p3822_p9 = pnand %p3821_p8, %p3815_p5 }
  0x49   :  { %3825 = shalt.err (!%p3822_p9)
}
  0x4a   :  { %120 = dma.hbm_to_vmem [thread:$0]  %s4782_s16, 64, %s118_s1, [#allocation12]  }
  0x4b   :  { %s4815_s6 = sld [smem:[#allocation31_spill]] }
  0x51   :  { %s3826_s27 = scalar_lea.hbm %s4815_s6, 16 }
  0x52   :  { %p3827_p10 = scmp.ne.s32.totalorder %s4815_s6, %s3826_s27  ;;  %p3830_p11 = scmp.lt.u32.totalorder %s3826_s27, %s4815_s6 }
  0x54   :  { %p3832_p12 = pnand %p3830_p11, %p3827_p10 }
  0x56   :  { %3835 = shalt.err (!%p3832_p12)
}
  0x57   :  { %s3836_s30 = scalar_lea.vmem %s54_s7, 16  ;;  %s3840_s2 = scalar_lea.vmem %s54_s7, 32 }
  0x58   :  { %p3837_p13 = scmp.ne.s32.totalorder %s54_s7, %s3836_s30  ;;  %p3841_p0 = scmp.lt.s32.totalorder %s54_s7, %s54_s7 }
  0x59   :  { %p3842_p1 = scmp.lt.s32.totalorder %s3840_s2, %s3836_s30 }
  0x5b   :  { %p3843_p2 = por %p3842_p1, %p3841_p0 }
  0x5d   :  { %p3844_p3 = pnand %p3843_p2, %p3837_p13 }
  0x5f   :  { %3847 = shalt.err (!%p3844_p3)
}
  0x60   :  { %56 = dma.hbm_to_vmem [thread:$0]  %s4815_s6, 16, %s54_s7, [#allocation3]  }
  0x61   :  { %s4020_s5 = smov [#allocation7]   ;;  %s4021_s28 = smov [#allocation10]  }
  0x62   :  { %s79_s12 = sshll.u32 %s4020_s5, 4  ;;  %s105_s10 = sshll.u32 %s4021_s28, 4  ;;  %s80_s12 = int_to_ptr.vmem [resolvable:$true] %s79_s12  ;;  %s106_s10 = int_to_ptr.vmem [resolvable:$true] %s105_s10 }
  0x63   :  { %s4816_s27 = sld [smem:[#allocation36_spill]] }
  0x69   :  { %s3848_s8 = scalar_lea.hbm %s4816_s27, 16 }
  0x6a   :  { %p3849_p4 = scmp.ne.s32.totalorder %s4816_s27, %s3848_s8  ;;  %p3852_p5 = scmp.lt.u32.totalorder %s3848_s8, %s4816_s27 }
  0x6c   :  { %p3854_p6 = pnand %p3852_p5, %p3849_p4 }
  0x6e   :  { %3857 = shalt.err (!%p3854_p6)
}
  0x6f   :  { %s3858_s7 = scalar_lea.vmem %s80_s12, 16  ;;  %s3862_s6 = scalar_lea.vmem %s80_s12, 32 }
  0x70   :  { %p3859_p7 = scmp.ne.s32.totalorder %s80_s12, %s3858_s7  ;;  %p3863_p8 = scmp.lt.s32.totalorder %s80_s12, %s80_s12 }
  0x71   :  { %p3864_p9 = scmp.lt.s32.totalorder %s3862_s6, %s3858_s7 }
  0x73   :  { %p3865_p10 = por %p3864_p9, %p3863_p8 }
  0x75   :  { %p3866_p11 = pnand %p3865_p10, %p3859_p7 }
  0x77   :  { %3869 = shalt.err (!%p3866_p11)
}
  0x78   :  { %82 = dma.hbm_to_vmem [thread:$0]  %s4816_s27, 16, %s80_s12, [#allocation6]  }
  0x79   :  { %s3870_s28 = scalar_lea.hbm %s4780_s14, 16 }
  0x7a   :  { %p3871_p12 = scmp.ne.s32.totalorder %s4780_s14, %s3870_s28  ;;  %p3874_p13 = scmp.lt.u32.totalorder %s3870_s28, %s4780_s14 }
  0x7c   :  { %p3876_p0 = pnand %p3874_p13, %p3871_p12 }
  0x7e   :  { %3879 = shalt.err (!%p3876_p0)
}
  0x7f   :  { %s3880_s9 = scalar_lea.vmem %s106_s10, 16  ;;  %s3884_s0 = scalar_lea.vmem %s106_s10, 32 }
  0x80   :  { %p3881_p1 = scmp.ne.s32.totalorder %s106_s10, %s3880_s9  ;;  %p3885_p2 = scmp.lt.s32.totalorder %s106_s10, %s106_s10 }
  0x81   :  { %p3886_p3 = scmp.lt.s32.totalorder %s3884_s0, %s3880_s9 }
  0x83   :  { %p3887_p4 = por %p3886_p3, %p3885_p2 }
  0x85   :  { %p3888_p5 = pnand %p3887_p4, %p3881_p1 }
  0x87   :  { %3891 = shalt.err (!%p3888_p5)
}
  0x88   :  { %108 = dma.hbm_to_vmem [thread:$0]  %s4780_s14, 16, %s106_s10, [#allocation9]  }
  0x89   :  { %s4022_s30 = smov [#allocation13]   ;;  %s4023_s6 = smov [#allocation14]  }
  0x8a   :  { %s133_s7 = sshll.u32 %s4022_s30, 4  ;;  %s147_s2 = sshll.u32 %s4023_s6, 4  ;;  %s134_s7 = int_to_ptr.vmem [resolvable:$true] %s133_s7  ;;  %s148_s2 = int_to_ptr.vmem [resolvable:$true] %s147_s2 }
  0x8b   :  { %s3892_s5 = scalar_lea.hbm %s4786_s20, 16 }
  0x8c   :  { %p3893_p6 = scmp.ne.s32.totalorder %s4786_s20, %s3892_s5  ;;  %p3896_p7 = scmp.lt.u32.totalorder %s3892_s5, %s4786_s20 }
  0x8e   :  { %p3898_p8 = pnand %p3896_p7, %p3893_p6 }
  0x90   :  { %3901 = shalt.err (!%p3898_p8)
}
  0x91   :  { %s3902_s14 = scalar_lea.vmem %s134_s7, 16  ;;  %s3906_s10 = scalar_lea.vmem %s134_s7, 32 }
  0x92   :  { %p3903_p9 = scmp.ne.s32.totalorder %s134_s7, %s3902_s14  ;;  %p3907_p10 = scmp.lt.s32.totalorder %s134_s7, %s134_s7 }
  0x93   :  { %p3908_p11 = scmp.lt.s32.totalorder %s3906_s10, %s3902_s14 }
  0x95   :  { %p3909_p12 = por %p3908_p11, %p3907_p10 }
  0x97   :  { %p3910_p13 = pnand %p3909_p12, %p3903_p9 }
  0x99   :  { %3913 = shalt.err (!%p3910_p13)
}
  0x9a   :  { %136 = dma.hbm_to_vmem [thread:$0]  %s4786_s20, 16, %s134_s7, [#allocation12]  }
  0x9b   :  { %s3914_s27 = scalar_lea.hbm %s4789_s23, 16 }
  0x9c   :  { %p3915_p0 = scmp.ne.s32.totalorder %s4789_s23, %s3914_s27  ;;  %p3918_p1 = scmp.lt.u32.totalorder %s3914_s27, %s4789_s23 }
  0x9e   :  { %p3920_p2 = pnand %p3918_p1, %p3915_p0 }
  0xa0   :  { %3923 = shalt.err (!%p3920_p2)
}
  0xa1   :  { %s3924_s5 = scalar_lea.vmem %s148_s2, 16  ;;  %s3928_s28 = scalar_lea.vmem %s148_s2, 32 }
  0xa2   :  { %p3925_p3 = scmp.ne.s32.totalorder %s148_s2, %s3924_s5  ;;  %p3929_p4 = scmp.lt.s32.totalorder %s148_s2, %s148_s2 }
  0xa3   :  { %p3930_p5 = scmp.lt.s32.totalorder %s3928_s28, %s3924_s5 }
  0xa5   :  { %p3931_p6 = por %p3930_p5, %p3929_p4 }
  0xa7   :  { %p3932_p7 = pnand %p3931_p6, %p3925_p3 }
  0xa9   :  { %3935 = shalt.err (!%p3932_p7)
}
  0xaa   :  { %150 = dma.hbm_to_vmem [thread:$0]  %s4789_s23, 16, %s148_s2, [#allocation15]  }
  0xab   :  { %4002 = dma.done.wait [#allocation3], 16  }
  0xac   :  { %4003 = vsyncadd [#allocation3], 4294967280 }
  0xad   :  { %4004 = dma.done.wait [#allocation6], 32  }
  0xae   :  { %4005 = vsyncadd [#allocation6], 4294967264 }
  0xaf   :  { %4006 = dma.done.wait [#allocation9], 32  }
  0xb0   :  { %4007 = vsyncadd [#allocation9], 4294967264 }
  0xb1   :  { %4008 = dma.done.wait [#allocation12], 80  }
  0xb2   :  { %4009 = vsyncadd [#allocation12], 4294967216 }
  0xb3   :  { %4010 = dma.done.wait [#allocation15], 16  }
  0xb4   :  { %4011 = vsyncadd [#allocation15], 4294967280  ;;  %v4024_v0 = vmov 0   ;;  %s4817_s8 = sld [smem:[#allocation30_spill]]  ;;  %s4818_s4 = sld [smem:[#allocation27_spill]]  ;;  %vm202_vm0 = vcmask 130048  }
  0xb5   :  { %241 = vmatprep.mubr.bf16.mxu0 %v4024_v0  ;;  %s4819_s20 = sld [smem:[#allocation29_spill]]  ;;  %vm332_vm1 = vcmask 261120   ;;  %s4820_s29 = sld [smem:[#allocation33_spill]]  ;;  %v2996_v50 = vld [vmem:[#allocation2] ss:$0 sm:$0xff]  ;;  %vm4026_vm2 = vmmov 0  }
  0xb6   :  { %s4822_s12 = sld [smem:[#allocation35_spill]]  ;;  %vm932_vm3 = vcmask 523264   ;;  %s4029_s27 = smov 96   ;;  %vm1443_vm4 = vcmask 58368   ;;  %vm1473_vm5 = vcmask 1043456   ;;  %vm1469_vm6 = vcmask 64512  }
  0xb7   :  { %s4823_s16 = sld [smem:[#allocation37_spill]]  ;;  %s4030_s7 = smov 120   ;;  %vm1699_vm7 = vcmask 1040384   ;;  %vm1695_vm8 = vcmask 15360  }
  0xb8   :  { %s4824_s14 = sld [smem:[#allocation28_spill]]  ;;  %s4031_s28 = smov 112  }
  0xba   :  { %v3635_v1 = vld [vmem:[%s4817_s8 + $0x4] ss:$12 sps:$4 sm:$0xff]   ;;  %v3637_v2 = vld [vmem:[%s4817_s8] ss:$12 sps:$4 sm:$0xff]   ;;  %v179_v7 = vld [vmem:[%s4818_s4 + $0x18] sm:$0xff] }
  0xbb   :  { %v176_v3 = vld [vmem:[%s4818_s4] sm:$0xff]  ;;  %v177_v4 = vld [vmem:[%s4818_s4 + $0x8] sm:$0xff]  ;;  %209 = vmatprep.subr.bf16.mxu0 %v3635_v1  ;;  %v178_v6 = vld [vmem:[%s4818_s4 + $0x10] sm:$0xff]  ;;  %s4821_s4 = sld [smem:[#allocation32_spill]] }
  0xbc   :  { %v180_v5 = vpack.c.bf16 %v177_v4, %v176_v3  ;;  %210 = vmatpush1.bf16.msra.mxu0 %v3637_v2  ;;  %v3638_v8 = vld [vmem:[%s4817_s8 + $0x8] ss:$12 sps:$4 sm:$0xff]   ;;  %v181_v9 = vpack.c.bf16 %v179_v7, %v178_v6  ;;  %v3639_v10 = vld [vmem:[%s4819_s20] sm:$0xff]   ;;  %v3648_v14 = vld [vmem:[%s4820_s29 + $0x10] ss:$8 sps:$4 sm:$0xff]   ;;  %v4025_v2 = vmov 0.0  }
  0xbd   :  { %3276 = vmatprep.subr.bf16.mxu1 %v3638_v8  ;;  %v3645_v11 = vld [vmem:[%s4820_s29] ss:$8 sps:$4 sm:$0xff]   ;;  %v3647_v12 = vld [vmem:[%s4820_s29 + $0x4] ss:$8 sps:$4 sm:$0xff]   ;;  %v3650_v13 = vld [vmem:[%s4820_s29 + $0x14] ss:$8 sps:$4 sm:$0xff]  }
  0xbe   :  { %3278 = vmatprep.mubr.msk.bf16.mxu1 %vm202_vm0, %v180_v5  ;;  %3277 = vmatpush3.bf16.msra.mxu1 %v3638_v8  ;;  %v3653_v15 = vld [vmem:[%s4820_s29 + $0x24] ss:$8 sps:$4 sm:$0xff]   ;;  %v3651_v16 = vld [vmem:[%s4820_s29 + $0x20] ss:$8 sps:$4 sm:$0xff]   ;;  %v3656_v17 = vld [vmem:[%s4820_s29 + $0x34] ss:$8 sps:$4 sm:$0xff]  }
  0xbf   :  { %2988 = vmatmul.mubr.msk.bf16.vlgmr.msra.gmra.mrb[0].mxu0 %vm202_vm0, %v180_v5  ;;  %648 = vmatprep.subr.bf16.mxu0 %v3647_v12  ;;  %v3654_v18 = vld [vmem:[%s4820_s29 + $0x30] ss:$8 sps:$4 sm:$0xff]   ;;  %v3659_v19 = vld [vmem:[%s4820_s29 + $0x44] ss:$8 sps:$4 sm:$0xff]   ;;  %v3657_v20 = vld [vmem:[%s4820_s29 + $0x40] ss:$8 sps:$4 sm:$0xff]  }
  0xc0   :  { %251 = vmatprep.mubr.bf16.mxu0 %v4024_v0  ;;  %649 = vmatpush1.bf16.msra.mxu0 %v3645_v11  ;;  %v3662_v21 = vld [vmem:[%s4820_s29 + $0x54] ss:$8 sps:$4 sm:$0xff]   ;;  %v3660_v22 = vld [vmem:[%s4820_s29 + $0x50] ss:$8 sps:$4 sm:$0xff]   ;;  %v3640_v41 = vld [vmem:[%s4819_s20 + $0x8] sm:$0xff]  }
  0xc1   :  { %3279 = vmatmul.mubr.msk.bf16.vlgmr.msra.gmra.mrb[0].mxu1 %vm202_vm0, %v181_v9  ;;  %650 = vmatprep.subr.bf16.mxu0 %v3650_v13  ;;  %v3641_v42 = vld [vmem:[%s4819_s20 + $0x10] sm:$0xff]   ;;  %v3642_v43 = vld [vmem:[%s4819_s20 + $0x18] sm:$0xff]   ;;  %v3643_v44 = vld [vmem:[%s4819_s20 + $0x20] sm:$0xff]  }
  0xc2   :  { %3286 = vmatprep.mubr.msk.bf16.mxu1 %vm332_vm1, %v3639_v10  ;;  %v3644_v45 = vld [vmem:[%s4819_s20 + $0x28] sm:$0xff]   ;;  %v3668_v48 = vld [vmem:[%s4820_s29 + $0x74] ss:$8 sps:$4 sm:$0xff]   ;;  %v3666_v49 = vld [vmem:[%s4820_s29 + $0x70] ss:$8 sps:$4 sm:$0xff]   ;;  %s4027_s20 = smov 64  }
  0xc3   :  { %v3665_v46 = vld [vmem:[%s4820_s29 + $0x64] ss:$8 sps:$4 sm:$0xff]   ;;  %v3663_v47 = vld [vmem:[%s4820_s29 + $0x60] ss:$8 sps:$4 sm:$0xff]   ;;  %s4032_s29 = smov [#allocation17]  }
  0xc4   :  { %651 = vmatpush1.bf16.msra.mxu0 %v3648_v14  ;;  %s2955_s2 = sshll.u32 %s4032_s29, 4  ;;  %s2956_s2 = int_to_ptr.vmem [resolvable:$true] %s2955_s2 }
  0xc5   :  { %652 = vmatprep.subr.bf16.mxu0 %v3653_v15  ;;  %v3669_v15 = vld [vmem:[%s4821_s4] sm:$0xff]   ;;  %s3936_s9 = scalar_lea.vmem %s2956_s2, 32  ;;  %p3941_p9 = scmp.lt.s32.totalorder %s2956_s2, %s2956_s2 }
  0xc6   :  { %p3937_p8 = scmp.ne.s32.totalorder %s2956_s2, %s3936_s9  ;;  %p3942_p10 = scmp.lt.s32.totalorder %s3936_s9, %s3936_s9 }
  0xc7   :  { %2989 = vmatmul.mubr.msk.bf16.gmra.mrb[4].mxu0 %vm202_vm0, %v181_v9 }
  0xc8   :  { %680 = vmatprep.mubr.bf16.mxu0 %v4024_v0  ;;  %653 = vmatpush1.bf16.msra.mxu0 %v3651_v16  ;;  %v3672_v16 = vld [vmem:[%s4822_s12] ss:$8 sps:$4 sm:$0xff]   ;;  %p3943_p11 = por %p3942_p10, %p3941_p9 }
  0xc9   :  { %654 = vmatprep.subr.bf16.mxu0 %v3656_v17  ;;  %v3674_v17 = vld [vmem:[%s4822_s12 + $0x4] ss:$8 sps:$4 sm:$0xff]  }
  0xca   :  { %p3944_p12 = pnand %p3943_p11, %p3937_p8 }
  0xcc   :  { %655 = vmatpush1.bf16.msra.mxu0 %v3654_v18  ;;  %v3677_v18 = vld [vmem:[%s4822_s12 + $0x14] ss:$8 sps:$4 sm:$0xff]  }
  0xcd   :  { %656 = vmatprep.subr.bf16.mxu0 %v3659_v19  ;;  %v3675_v19 = vld [vmem:[%s4822_s12 + $0x10] ss:$8 sps:$4 sm:$0xff]  }
  0xd0   :  { %657 = vmatpush1.bf16.msra.mxu0 %v3657_v20 }
  0xd1   :  { %658 = vmatprep.subr.bf16.mxu0 %v3662_v21 }
  0xd4   :  { %659 = vmatpush1.bf16.msra.mxu0 %v3660_v22  ;;  %v3670_v22 = vld [vmem:[%s4821_s4 + $0x8] sm:$0xff]  }
  0xd5   :  { %660 = vmatprep.subr.bf16.mxu0 %v3665_v46  ;;  %v3051_v46 = vld [vmem:[%s4823_s16 + $0x1] sm:$0x1] }
  0xd8   :  { %661 = vmatpush1.bf16.msra.mxu0 %v3663_v47 }
  0xd9   :  { %662 = vmatprep.subr.bf16.mxu0 %v3668_v48  ;;  %v3053_v48 = vld [vmem:[%s4823_s16 + $0x2] sm:$0x1] }
  0xdc   :  { %663 = vmatpush1.bf16.msra.mxu0 %v3666_v49 }
  0xdd   :  { %936 = vmatprep.subr.bf16.mxu0 %v3674_v17 }
 0x192   :  { %v243_v23 = vpop.f32.mrb[0].mxu0 }
 0x193   :  { %v245_v24 = vpop.f32.mrb[1].mxu0 }
 0x194   :  { %v247_v25 = vpop.f32.mrb[2].mxu0  ;;  %v3280_v28 = vpop.f32.mrb[0].mxu1 }
 0x195   :  { %v311_v26 = vpack.c.bf16 %v247_v25, %v243_v23  ;;  %v249_v27 = vpop.f32.mrb[3].mxu0  ;;  %v296_v30 = vpop.f32.mrb[1].mxu1  ;;  %v3671_v23 = vld [vmem:[%s4821_s4 + $0x10] sm:$0xff]   ;;  %v3678_v25 = vld [vmem:[%s4822_s12 + $0x20] ss:$8 sps:$4 sm:$0xff]  }
 0x196   :  { %v312_v29 = vpack.c.bf16 %v249_v27, %v245_v24  ;;  %v3281_v31 = vpop.f32.mrb[2].mxu1  ;;  %v3680_v24 = vld [vmem:[%s4822_s12 + $0x24] ss:$8 sps:$4 sm:$0xff]   ;;  %v3681_v27 = vld [vmem:[%s4822_s12 + $0x30] ss:$8 sps:$4 sm:$0xff]  }
 0x197   :  { %3282 = vmatprep.subr.bf16.mxu1 %v311_v26  ;;  %v316_v32 = vpack.c.bf16 %v3281_v31, %v3280_v28  ;;  %v299_v33 = vpop.f32.mrb[3].mxu1  ;;  %v3031_v28 = vld [vmem:[#allocation5] ss:$0 sm:$0xff] }
 0x198   :  { %3283 = vmatpush3.bf16.msra.mxu1 %v311_v26  ;;  %v313_v34 = vpack.c.bf16 %v299_v33, %v296_v30  ;;  %v3683_v26 = vld [vmem:[%s4822_s12 + $0x34] ss:$8 sps:$4 sm:$0xff]   ;;  %s4028_s12 = smov 32  }
 0x19a   :  { %v253_v35 = vpop.f32.mrb[4].mxu0 }
 0x19b   :  { %v255_v36 = vpop.f32.mrb[5].mxu0 }
 0x19c   :  { %v257_v37 = vpop.f32.mrb[6].mxu0 }
 0x19d   :  { %v314_v38 = vpack.c.bf16 %v257_v37, %v253_v35  ;;  %v259_v39 = vpop.f32.mrb[7].mxu0 }
 0x19e   :  { %v315_v40 = vpack.c.bf16 %v259_v39, %v255_v36 }
 0x19f   :  { %3284 = vmatprep.subr.bf16.mxu1 %v314_v38 }
 0x1a0   :  { %3285 = vmatpush3.bf16.msra.mxu1 %v314_v38 }
 0x1a1   :  { %3290 = vmatprep.subr.bf16.mxu1 %v312_v29 }
 0x1a3   :  { %3287 = vmatmul.mubr.msk.bf16.vlgmr.msra.gmra.mrb[4].mxu1 %vm332_vm1, %v3640_v41 }
 0x1a4   :  { %3291 = vmatpush3.bf16.msra.mxu1 %v312_v29  ;;  %3294 = vmatprep.mubr.msk.bf16.mxu1 %vm332_vm1, %v3641_v42 }
 0x1a5   :  { %3292 = vmatprep.subr.bf16.mxu1 %v315_v40 }
 0x1a8   :  { %3293 = vmatpush3.bf16.msra.mxu1 %v315_v40 }
 0x1a9   :  { %3298 = vmatprep.subr.bf16.mxu1 %v313_v34 }
 0x1af   :  { %3295 = vmatmul.mubr.msk.bf16.vlgmr.msra.gmra.mrb[4].mxu1 %vm332_vm1, %v3642_v43 }
 0x1b0   :  { %3299 = vmatpush3.bf16.msra.mxu1 %v313_v34  ;;  %3302 = vmatprep.mubr.msk.bf16.mxu1 %vm332_vm1, %v3643_v44  ;;  %v982_v44 = vld [vmem:[%s4823_s16] sm:$0x1] }
 0x1b1   :  { %3300 = vmatprep.subr.bf16.mxu1 %v316_v32 }
 0x1b4   :  { %3301 = vmatpush3.bf16.msra.mxu1 %v316_v32 }
 0x1b5   :  { %3306 = vmatprep.subr.bf16.mxu1 %v4025_v2 }
 0x1bb   :  { %3303 = vmatmul.mubr.msk.bf16.vlgmr.msra.gmra.mrb[4].mxu1 %vm332_vm1, %v3644_v45 }
 0x1bc   :  { %3310 = vmatprep.mubr.msk.bf16.mxu1 %vm4026_vm2, %v4025_v2 }
 0x28e   :  { %v3304_v51 = vpop.f32.mrb[4].mxu1 }
 0x28f   :  { %v3514_v52 = vadd.f32 %v3304_v51, %v2996_v50  ;;  %v527_v53 = vpop.f32.mrb[5].mxu1  ;;  %v3057_v51 = vld [vmem:[%s4823_s16 + $0x4] sm:$0x1] }
 0x290   :  { %v3515_v54 = vadd.f32 %v2996_v50, %v527_v53  ;;  %v3305_v55 = vpop.f32.mrb[6].mxu1  ;;  %v3059_v53 = vld [vmem:[%s4823_s16 + $0x5] sm:$0x1] }
 0x291   :  { %v3516_v56 = vadd.f32 %v3305_v55, %v2996_v50  ;;  %v530_v57 = vpop.f32.mrb[7].mxu1  ;;  %v548_v59 = vmax.f32 %v3514_v52, 0.0  ;;  %v3061_v55 = vld [vmem:[%s4823_s16 + $0x6] sm:$0x1] }
 0x292   :  { %v3517_v58 = vadd.f32 %v2996_v50, %v530_v57  ;;  %v546_v61 = vmax.f32 %v3515_v54, 0.0  ;;  %v3055_v50 = vld [vmem:[%s4823_s16 + $0x3] sm:$0x1]  ;;  %v3063_v57 = vld [vmem:[%s4823_s16 + $0x7] sm:$0x1] }
 0x293   :  { %v549_v60 = vmax.f32 %v3516_v56, 0.0 }
 0x294   :  { %v547_v62 = vmax.f32 %v3517_v58, 0.0 }
 0x295   :  { %v551_v63 = vpack.c.bf16 %v549_v60, %v548_v59 }
 0x296   :  { %v550_v1 = vpack.c.bf16 %v547_v62, %v546_v61  ;;  %v3684_v62 = vld [vmem:[%s4777_s11] sm:$0xff]  }
 0x298   :  { %681 = vmatmul.mubr.bf16.vlgmr.msra.gmra.mrb[8].mxu0 %v550_v1  ;;  %v3050_v1 = vld [vmem:[#allocation7] ss:$0 sm:$0xff] }
 0x299   :  { %690 = vmatprep.mubr.bf16.mxu0 %v4024_v0  ;;  %937 = vmatpush1.bf16.msra.mxu0 %v3672_v16 }
 0x29a   :  { %938 = vmatprep.subr.bf16.mxu0 %v3677_v18 }
 0x29d   :  { %939 = vmatpush1.bf16.msra.mxu0 %v3675_v19  ;;  %v1461_v19 = vld [vmem:[%s4779_s13] sm:$0xf] }
 0x29e   :  { %940 = vmatprep.subr.bf16.mxu0 %v3680_v24 }
 0x2a0   :  { %691 = vmatmul.mubr.bf16.gmra.mrb[12].mxu0 %v551_v63  ;;  %v3685_v63 = vld [vmem:[%s4777_s11 + $0x8] sm:$0xff]  }
 0x2a1   :  { %968 = vmatprep.mubr.bf16.mxu0 %v4024_v0  ;;  %941 = vmatpush1.bf16.msra.mxu0 %v3678_v25 }
 0x2a2   :  { %942 = vmatprep.subr.bf16.mxu0 %v3683_v26 }
 0x2a5   :  { %943 = vmatpush1.bf16.msra.mxu0 %v3681_v27  ;;  %v3686_v27 = vld [vmem:[%s4781_s15] ss:$16 sps:$4 sm:$0xff]  }
 0x2a6   :  { %3336 = vmatprep.subr.bf16.mxu0 %v4025_v2 }
 0x36b   :  { %v682_v3 = vpop.f32.mrb[8].mxu0 }
 0x36c   :  { %v684_v4 = vpop.f32.mrb[9].mxu0 }
 0x36d   :  { %v686_v5 = vpop.f32.mrb[10].mxu0 }
 0x36e   :  { %v701_v6 = vpack.c.bf16 %v686_v5, %v682_v3  ;;  %v688_v7 = vpop.f32.mrb[11].mxu0 }
 0x36f   :  { %v702_v8 = vpack.c.bf16 %v688_v7, %v684_v4 }
 0x370   :  { %775 = vrot.lane.b32.xlu0 %v701_v6, %s4027_s20  ;;  %3307 = vmatpush3.bf16.msra.mxu1 %v701_v6 }
 0x371   :  { %3308 = vmatprep.subr.bf16.mxu1 %v4025_v2 }
 0x373   :  { %v692_v9 = vpop.f32.mrb[12].mxu0 }
 0x374   :  { %v694_v10 = vpop.f32.mrb[13].mxu0 }
 0x375   :  { %v696_v11 = vpop.f32.mrb[14].mxu0 }
 0x376   :  { %v703_v12 = vpack.c.bf16 %v696_v11, %v692_v9  ;;  %v698_v13 = vpop.f32.mrb[15].mxu0  ;;  %v3065_v11 = vld [vmem:[#allocation8] ss:$0 sm:$0xff] }
 0x377   :  { %v704_v14 = vpack.c.bf16 %v698_v13, %v694_v10 }
 0x378   :  { %777 = vrot.lane.b32.xlu0 %v703_v12, %s4027_s20  ;;  %3309 = vmatpush3.bf16.msra.mxu1 %v703_v12 }
 0x379   :  { %3314 = vmatprep.subr.bf16.mxu1 %v4025_v2 }
 0x37b   :  { %3311 = vmatmul.mubr.msk.bf16.vlgmr.msra.gmra.mrb[8].mxu1 %vm332_vm1, %v3669_v15 }
 0x37c   :  { %3318 = vmatprep.mubr.msk.bf16.mxu1 %vm4026_vm2, %v4025_v2 }
 0x3e2   :  { %v776_v20 = vpop.permute.xlu0 %775 }
 0x3e3   :  { %3315 = vmatpush3.bf16.msra.mxu1 %v776_v20  ;;  %v1475_v20 = vsel %vm1473_vm5, %v1461_v19, 0 }
 0x3e4   :  { %3316 = vmatprep.subr.bf16.mxu1 %v4025_v2 }
 0x3ea   :  { %v778_v21 = vpop.permute.xlu0 %777 }
 0x3eb   :  { %3317 = vmatpush3.bf16.msra.mxu1 %v778_v21  ;;  %v3688_v21 = vld [vmem:[%s4781_s15 + $0x4] ss:$16 sps:$4 sm:$0xff]  }
 0x3ec   :  { %3322 = vmatprep.subr.bf16.mxu1 %v4025_v2 }
 0x3ee   :  { %3319 = vmatmul.mubr.msk.bf16.vlgmr.msra.gmra.mrb[8].mxu1 %vm332_vm1, %v3670_v22 }
 0x3ef   :  { %3323 = vmatpush3.bf16.msra.mxu1 %v702_v8  ;;  %3326 = vmatprep.mubr.msk.bf16.mxu1 %vm4026_vm2, %v4025_v2 }
 0x3f0   :  { %3324 = vmatprep.subr.bf16.mxu1 %v4025_v2 }
 0x3f3   :  { %3325 = vmatpush3.bf16.msra.mxu1 %v704_v14 }
 0x3f4   :  { %3330 = vmatprep.subr.bf16.mxu1 %v4025_v2 }
 0x3fa   :  { %3327 = vmatmul.mubr.msk.bf16.vlgmr.msra.gmra.mrb[8].mxu1 %vm332_vm1, %v3671_v23  ;;  %v1450_v23 = vld [vmem:[%s4824_s14] sm:$0x3] }
 0x3fb   :  { %3332 = vmatprep.mubr.msk.bf16.mxu1 %vm4026_vm2, %v4025_v2 }
 0x4cd   :  { %v872_v29 = vpop.f32.mrb[8].mxu1 }
 0x4ce   :  { %v3518_v30 = vadd.f32 %v3031_v28, %v872_v29  ;;  %v3328_v31 = vpop.f32.mrb[9].mxu1  ;;  %v3691_v29 = vld [vmem:[%s4781_s15 + $0x24] ss:$16 sps:$4 sm:$0xff]  }
 0x4cf   :  { %v875_v32 = vpop.f32.mrb[10].mxu1  ;;  %v3694_v31 = vld [vmem:[%s4781_s15 + $0xc] ss:$16 sps:$4 sm:$0xff]  }
 0x4d0   :  { %v3519_v33 = vadd.f32 %v3031_v28, %v875_v32  ;;  %v3329_v34 = vpop.f32.mrb[11].mxu1  ;;  %v881_v35 = vmax.f32 %v3518_v30, 0.0  ;;  %v3689_v30 = vld [vmem:[%s4781_s15 + $0x20] ss:$16 sps:$4 sm:$0xff]   ;;  %v3069_v32 = vld [vmem:[#allocation10] ss:$0 sm:$0xff] }
 0x4d2   :  { %v882_v36 = vmax.f32 %v3519_v33, 0.0 }
 0x4d4   :  { %v883_v37 = vpack.c.bf16 %v882_v36, %v881_v35 }
 0x4d6   :  { %3048 = vmatmul.mubr.msk.bf16.vlgmr.msra.gmra.mrb[16].mxu0 %vm932_vm3, %v883_v37 }
 0x4d7   :  { %3338 = vmatprep.mubr.msk.bf16.mxu0 %vm4026_vm2, %v4025_v2 }
 0x5a9   :  { %v970_v38 = vpop.f32.mrb[16].mxu0 }
 0x5aa   :  { %v972_v39 = vpop.f32.mrb[17].mxu0 }
 0x5ab   :  { %v974_v40 = vpop.f32.mrb[18].mxu0 }
 0x5ac   :  { %v979_v41 = vpack.c.bf16 %v974_v40, %v970_v38  ;;  %v976_v42 = vpop.f32.mrb[19].mxu0 }
 0x5ad   :  { %v980_v43 = vpack.c.bf16 %v976_v42, %v972_v39  ;;  %v3692_v39 = vld [vmem:[%s4781_s15 + $0x8] ss:$16 sps:$4 sm:$0xff]  }
 0x5ae   :  { %1134 = vrot.lane.b32.xlu0 %v979_v41, %s4028_s12  ;;  %1036 = vrot.lane.b32.xlu1 %v979_v41, %s4029_s27  ;;  %v3695_v42 = vld [vmem:[%s4781_s15 + $0x28] ss:$16 sps:$4 sm:$0xff]  }
 0x5af   :  { %3331 = vmatpush3.bf16.msra.mxu1 %v979_v41 }
 0x5b0   :  { %3378 = vmatprep.subr.bf16.mxu1 %v4025_v2 }
 0x5b2   :  { %1085 = vrot.lane.b32.xlu1 %v979_v41, %s4027_s20  ;;  %1279 = vrot.lane.b32.xlu0 %v980_v43, %s4027_s20  ;;  %v3697_v41 = vld [vmem:[%s4781_s15 + $0x2c] ss:$16 sps:$4 sm:$0xff]  }
 0x5b3   :  { %3333 = vmatmul.mubr.msk.bf16.vlgmr.msra.gmra.mrb[12].mxu1 %vm202_vm0, %v982_v44 }
 0x5b4   :  { %3382 = vmatprep.mubr.msk.bf16.mxu1 %vm4026_vm2, %v4025_v2  ;;  %3379 = vmatpush3.bf16.msra.mxu1 %v3684_v62 }
 0x5b5   :  { %3380 = vmatprep.subr.bf16.mxu1 %v4025_v2 }
 0x5b6   :  { %1230 = vrot.lane.b32.xlu1 %v980_v43, %s4029_s27 }
 0x5b8   :  { %3381 = vmatpush3.bf16.msra.mxu1 %v3685_v63 }
 0x5b9   :  { %3386 = vmatprep.subr.bf16.mxu1 %v4025_v2 }
 0x5ba   :  { %1328 = vrot.lane.b32.xlu1 %v980_v43, %s4028_s12 }
 0x620   :  { %v1037_v45 = vpop.permute.xlu1 %1036  ;;  %v1135_v49 = vpop.permute.xlu0 %1134 }
 0x621   :  { %3337 = vmatpush3.bf16.msra.mxu0 %v1037_v45 }
 0x622   :  { %3342 = vmatprep.subr.bf16.mxu0 %v4025_v2 }
 0x624   :  { %3339 = vmatmul.mubr.msk.bf16.vlgmr.msra.gmra.mrb[20].mxu0 %vm202_vm0, %v3051_v46  ;;  %v1086_v47 = vpop.permute.xlu1 %1085  ;;  %v1280_v54 = vpop.permute.xlu0 %1279  ;;  %v1527_v46 = vld [vmem:[#allocation11] sm:$0xf] }
 0x625   :  { %3343 = vmatpush3.bf16.msra.mxu0 %v1086_v47  ;;  %3344 = vmatprep.mubr.msk.bf16.mxu0 %vm4026_vm2, %v4025_v2 }
 0x626   :  { %3348 = vmatprep.subr.bf16.mxu0 %v4025_v2 }
 0x628   :  { %v1231_v52 = vpop.permute.xlu1 %1230 }
 0x62c   :  { %v1329_v56 = vpop.permute.xlu1 %1328 }
 0x630   :  { %3345 = vmatmul.mubr.msk.bf16.vlgmr.msra.gmra.mrb[20].mxu0 %vm202_vm0, %v3053_v48 }
 0x631   :  { %3349 = vmatpush3.bf16.msra.mxu0 %v1135_v49  ;;  %3350 = vmatprep.mubr.msk.bf16.mxu0 %vm4026_vm2, %v4025_v2 }
 0x632   :  { %3354 = vmatprep.subr.bf16.mxu0 %v4025_v2 }
 0x63c   :  { %3351 = vmatmul.mubr.msk.bf16.vlgmr.msra.gmra.mrb[20].mxu0 %vm202_vm0, %v3055_v50 }
 0x63d   :  { %3355 = vmatpush3.bf16.msra.mxu0 %v980_v43  ;;  %3356 = vmatprep.mubr.msk.bf16.mxu0 %vm4026_vm2, %v4025_v2  ;;  %v1529_v43 = vlaneseq }
 0x63e   :  { %3360 = vmatprep.subr.bf16.mxu0 %v4025_v2 }
 0x63f   :  { %v1530_v44 = vshrl.u32 %v1529_v43, 7  ;;  %v3718_v43 = vld [vmem:[%s4785_s19 + $0x8] ss:$12 sps:$4 sm:$0xff]  }
 0x641   :  { %v1531_v45 = vsub.s32 0, %v1530_v44  ;;  %v1535_v47 = vsub.s32 1, %v1530_v44 }
 0x643   :  { %v1532_v48 = vrot.slane %v1527_v46, %v1531_v45  ;;  %v1536_v49 = vrot.slane %v1527_v46, %v1535_v47  ;;  %v3720_v47 = vld [vmem:[%s4785_s19 + $0x38] ss:$12 sps:$4 sm:$0xff]  }
 0x648   :  { %3357 = vmatmul.mubr.msk.bf16.vlgmr.msra.gmra.mrb[20].mxu0 %vm202_vm0, %v3057_v51 }
 0x649   :  { %3361 = vmatpush3.bf16.msra.mxu0 %v1231_v52  ;;  %3362 = vmatprep.mubr.msk.bf16.mxu0 %vm4026_vm2, %v4025_v2 }
 0x64a   :  { %3366 = vmatprep.subr.bf16.mxu0 %v4025_v2 }
 0x654   :  { %3363 = vmatmul.mubr.msk.bf16.vlgmr.msra.gmra.mrb[20].mxu0 %vm202_vm0, %v3059_v53 }
 0x655   :  { %3367 = vmatpush3.bf16.msra.mxu0 %v1280_v54  ;;  %3368 = vmatprep.mubr.msk.bf16.mxu0 %vm4026_vm2, %v4025_v2 }
 0x656   :  { %3372 = vmatprep.subr.bf16.mxu0 %v4025_v2 }
 0x660   :  { %3369 = vmatmul.mubr.msk.bf16.vlgmr.msra.gmra.mrb[20].mxu0 %vm202_vm0, %v3061_v55  ;;  %v1543_v55 = vsub.s32 3, %v1530_v44 }
 0x661   :  { %3373 = vmatpush3.bf16.msra.mxu0 %v1329_v56  ;;  %3374 = vmatprep.mubr.msk.bf16.mxu0 %vm4026_vm2, %v4025_v2 }
 0x662   :  { %v1544_v62 = vrot.slane %v1527_v46, %v1543_v55 }
 0x66c   :  { %3375 = vmatmul.mubr.msk.bf16.vlgmr.msra.gmra.mrb[20].mxu0 %vm202_vm0, %v3063_v57 }
 0x66d   :  { %2263 = vmatprep.mubr.bf16.mxu0 %v4024_v0 }
 0x686   :  { %v1020_v58 = vpop.f32.mrb[12].mxu1 }
 0x687   :  { %v3334_v59 = vpop.f32.mrb[13].mxu1  ;;  %v1032_v3 = vadd.f32 %v3050_v1, %v1020_v58 }
 0x688   :  { %v1023_v60 = vpop.f32.mrb[14].mxu1 }
 0x689   :  { %v3335_v61 = vpop.f32.mrb[15].mxu1 }
 0x73f   :  { %v1368_v4 = vpop.f32.mrb[20].mxu0 }
 0x740   :  { %v3521_v5 = vadd.f32 %v1368_v4, %v1032_v3  ;;  %v3376_v6 = vpop.f32.mrb[21].mxu0 }
 0x741   :  { %v1371_v7 = vpop.f32.mrb[22].mxu0 }
 0x742   :  { %v1375_v8 = vmax.f32 %v3521_v5, 0.0  ;;  %v3377_v9 = vpop.f32.mrb[23].mxu0 }
 0x744   :  { %v1376_v10 = vpack.c.bf16 %v1375_v8, %v1375_v8 }
 0x746   :  { %3383 = vmatmul.mubr.msk.bf16.vlgmr.msra.gmra.mrb[16].mxu1 %vm332_vm1, %v1376_v10 }
 0x747   :  { %3388 = vmatprep.mubr.msk.bf16.mxu1 %vm4026_vm2, %v4025_v2  ;;  %3387 = vmatpush3.bf16.msra.mxu1 %v1475_v20  ;;  %v3698_v20 = vld [vmem:[%s4783_s17 + $0x8] sm:$0xff]  }
 0x748   :  { %1592 = vmatprep.subr.bf16.mxu1 %v3688_v21 }
 0x819   :  { %v1437_v12 = vpop.f32.mrb[16].mxu1 }
 0x81a   :  { %v4496_v13 = vadd.f32 %v3065_v11, %v1437_v12  ;;  %v3384_v14 = vpop.f32.mrb[17].mxu1  ;;  %v3706_v11 = vld [vmem:[%s4785_s19] ss:$12 sps:$4 sm:$0xff]   ;;  %v3708_v12 = vld [vmem:[%s4785_s19 + $0x4] ss:$12 sps:$4 sm:$0xff]  }
 0x81b   :  { %v1440_v15 = vpop.f32.mrb[18].mxu1  ;;  %v3711_v14 = vld [vmem:[%s4785_s19 + $0x1c] ss:$12 sps:$4 sm:$0xff]   ;;  %2231 = vmatprep.subr.bf16.mxu0 %v3708_v12 }
 0x81c   :  { %v1451_v16 = vmul.f32 0.5, %v4496_v13  ;;  %v3385_v17 = vpop.f32.mrb[19].mxu1  ;;  %1444 = vst.msk [vmem:[#allocation17] sm:$0x3] %vm1443_vm4, %v4496_v13  ;;  %2232 = vmatpush1.bf16.msra.mxu0 %v3706_v11  ;;  %v3709_v15 = vld [vmem:[%s4785_s19 + $0x18] ss:$12 sps:$4 sm:$0xff]  }
 0x81d   :  { %2233 = vmatprep.subr.bf16.mxu0 %v3711_v14  ;;  %v3712_v17 = vld [vmem:[%s4785_s19 + $0x30] ss:$12 sps:$4 sm:$0xff]  }
 0x81e   :  { %v1452_v18 = vmul.f32 1.442695, %v1451_v16  ;;  %v3714_v16 = vld [vmem:[%s4785_s19 + $0x34] ss:$12 sps:$4 sm:$0xff]  }
 0x820   :  { %3742 = vpow2.f32 %v1452_v18  ;;  %2234 = vmatpush1.bf16.msra.mxu0 %v3709_v15 }
 0x821   :  { %2235 = vmatprep.subr.bf16.mxu0 %v3714_v16 }
 0x824   :  { %2236 = vmatpush1.bf16.msra.mxu0 %v3712_v17 }
 0x82a   :  { %v3743_v22 = vpop.eup %3742 }
 0x82b   :  { %1455 = vrot.lane.b32.xlu0 %v3743_v22, %s4030_s7  ;;  %v3699_v22 = vld [vmem:[%s4783_s17] sm:$0xff]  }
 0x89d   :  { %v1456_v24 = vpop.permute.xlu0 %1455 }
 0x89e   :  { %v1458_v25 = vmul.f32 %v1456_v24, %v1450_v23  ;;  %v3700_v24 = vld [vmem:[%s4783_s17 + $0x10] sm:$0xff]  }
 0x8a0   :  { %v1459_v26 = vadd.f32 %v1458_v25, %v4496_v13 }
 0x8a2   :  { %v1460_v28 = vpack.c.bf16 %v1459_v26, %v1459_v26 }
 0x8a4   :  { %3389 = vmatmul.mubr.msk.bf16.vlgmr.msra.gmra.mrb[20].mxu1 %vm1469_vm6, %v1460_v28 }
 0x8a5   :  { %1593 = vmatpush1.bf16.msra.mxu1 %v3686_v27  ;;  %1624 = vmatprep.mubr.bf16.mxu1 %v4024_v0  ;;  %v3701_v27 = vld [vmem:[%s4783_s17 + $0x18] sm:$0xff]  }
 0x8a6   :  { %1594 = vmatprep.subr.bf16.mxu1 %v3691_v29  ;;  %v3702_v29 = vld [vmem:[%s4783_s17 + $0x20] sm:$0xff]  }
 0x8a9   :  { %1595 = vmatpush1.bf16.msra.mxu1 %v3689_v30 }
 0x8aa   :  { %1633 = vmatprep.subr.bf16.mxu1 %v3694_v31 }
 0x977   :  { %v1511_v33 = vpop.f32.mrb[20].mxu1 }
 0x978   :  { %v1512_v34 = vadd.f32 %v3069_v32, %v1511_v33  ;;  %v3390_v35 = vpop.f32.mrb[21].mxu1  ;;  %v3703_v32 = vld [vmem:[%s4783_s17 + $0x28] sm:$0xff]  }
 0x979   :  { %v1514_v36 = vpop.f32.mrb[22].mxu1 }
 0x97a   :  { %v1517_v37 = vmax.f32 %v1512_v34, 0.0  ;;  %v3391_v38 = vpop.f32.mrb[23].mxu1  ;;  %v3704_v34 = vld [vmem:[%s4783_s17 + $0x30] sm:$0xff]  }
 0x97b   :  { %v3717_v38 = vld [vmem:[%s4785_s19 + $0x4c] ss:$12 sps:$4 sm:$0xff]  }
 0x97c   :  { %v1518_v40 = vpack.c.bf16 %v1517_v37, %v1517_v37  ;;  %v3705_v37 = vld [vmem:[%s4783_s17 + $0x38] sm:$0xff]   ;;  %2237 = vmatprep.subr.bf16.mxu0 %v3717_v38 }
 0x97d   :  { %v3739_v38 = vld [vmem:[%s4787_s21 + $0x18] sm:$0xff]  }
 0x97e   :  { %3079 = vmatmul.mubr.msk.bf16.vlgmr.msra.gmra.mrb[24].mxu1 %vm332_vm1, %v1518_v40 }
 0x97f   :  { %1634 = vmatpush1.bf16.msra.mxu1 %v3692_v39  ;;  %1665 = vmatprep.mubr.bf16.mxu1 %v4024_v0  ;;  %v1539_v0 = vsub.s32 2, %v1530_v44  ;;  %v3715_v39 = vld [vmem:[%s4785_s19 + $0x48] ss:$12 sps:$4 sm:$0xff]  }
 0x980   :  { %1635 = vmatprep.subr.bf16.mxu1 %v3697_v41  ;;  %2238 = vmatpush1.bf16.msra.mxu0 %v3715_v39  ;;  %v3740_v39 = vld [vmem:[%s4787_s21 + $0x20] sm:$0xff]  }
 0x981   :  { %v1540_v60 = vrot.slane %v1527_v46, %v1539_v0  ;;  %3440 = vmatprep.subr.bf16.mxu0 %v4025_v2  ;;  %v3719_v46 = vld [vmem:[%s4785_s19 + $0x20] ss:$12 sps:$4 sm:$0xff]  }
 0x982   :  { %v3732_v0 = vld [vmem:[%s4788_s22 + $0x20] sm:$0xff]  }
 0x983   :  { %1636 = vmatpush1.bf16.msra.mxu1 %v3695_v42 }
 0x984   :  { %3392 = vmatprep.subr.bf16.mxu1 %v4025_v2 }
 0x986   :  { %3080 = vmatmul.mubr.msk.bf16.vlgmr.msra.gmra.mrb[28].mxu1 %vm332_vm1, %v1518_v40 }
 0x987   :  { %3394 = vmatprep.mubr.msk.bf16.mxu1 %vm4026_vm2, %v4025_v2 }
 0xa51   :  { %v1626_v50 = vpop.f32.mrb[24].mxu1 }
 0xa52   :  { %v1627_v51 = vadd.f32 %v1626_v50, %v1532_v48  ;;  %v1628_v52 = vpop.f32.mrb[25].mxu1  ;;  %v3721_v48 = vld [vmem:[%s4785_s19 + $0x50] ss:$12 sps:$4 sm:$0xff]   ;;  %v3728_v50 = vld [vmem:[%s4788_s22] sm:$0xff]  }
 0xa53   :  { %v1629_v53 = vadd.f32 %v1628_v52, %v1536_v49  ;;  %v1630_v54 = vpop.f32.mrb[26].mxu1  ;;  %v3722_v49 = vld [vmem:[%s4784_s18] sm:$0xff]   ;;  %v3731_v52 = vld [vmem:[%s4788_s22 + $0x18] sm:$0xff]  }
 0xa54   :  { %v1674_v56 = vmax.f32 %v1627_v51, 0.0  ;;  %v1631_v57 = vpop.f32.mrb[27].mxu1  ;;  %v3729_v51 = vld [vmem:[%s4788_s22 + $0x8] sm:$0xff]  }
 0xa55   :  { %v1675_v58 = vmax.f32 %v1629_v53, 0.0  ;;  %v3733_v53 = vld [vmem:[%s4788_s22 + $0x28] sm:$0xff]  }
 0xa56   :  { %v1678_v59 = vpack.c.bf16 %v1674_v56, %v1674_v56 }
 0xa57   :  { %v1679_v61 = vpack.c.bf16 %v1675_v58, %v1675_v58 }
 0xa58   :  { %1693 = vrot.lane.b32.xlu1 %v1678_v59, %s4027_s20  ;;  %v1753_v21 = vsel %vm1699_vm7, %v1678_v59, 0 }
 0xa59   :  { %v1667_v63 = vpop.f32.mrb[28].mxu1  ;;  %1862 = vrot.lane.b32.xlu0 %v1679_v61, %s4027_s20  ;;  %v1808_v23 = vsel %vm1699_vm7, %v1679_v61, 0  ;;  %v3724_v61 = vld [vmem:[%s4784_s18 + $0x10] sm:$0xff]  }
 0xa5a   :  { %v1668_v1 = vadd.f32 %v1667_v63, %v1540_v60  ;;  %v1669_v3 = vpop.f32.mrb[29].mxu1  ;;  %v3723_v60 = vld [vmem:[%s4784_s18 + $0x8] sm:$0xff]  }
 0xa5b   :  { %v1670_v4 = vadd.f32 %v1669_v3, %v1544_v62  ;;  %v1671_v5 = vpop.f32.mrb[30].mxu1 }
 0xa5c   :  { %v1676_v6 = vmax.f32 %v1668_v1, 0.0  ;;  %v1672_v7 = vpop.f32.mrb[31].mxu1  ;;  %v3725_v1 = vld [vmem:[%s4784_s18 + $0x18] sm:$0xff]  }
 0xa5d   :  { %v1677_v8 = vmax.f32 %v1670_v4, 0.0  ;;  %v3726_v4 = vld [vmem:[%s4784_s18 + $0x20] sm:$0xff]   ;;  %v3727_v7 = vld [vmem:[%s4784_s18 + $0x28] sm:$0xff]  }
 0xa5e   :  { %v1680_v9 = vpack.c.bf16 %v1676_v6, %v1676_v6 }
 0xa5f   :  { %v1681_v10 = vpack.c.bf16 %v1677_v8, %v1677_v8  ;;  %v3734_v8 = vld [vmem:[%s4788_s22 + $0x30] sm:$0xff]  }
 0xa60   :  { %1979 = vrot.lane.b32.xlu1 %v1680_v9, %s4027_s20  ;;  %v1925_v28 = vsel %vm1699_vm7, %v1680_v9, 0  ;;  %v3735_v9 = vld [vmem:[%s4788_s22 + $0x38] sm:$0xff]  }
 0xa61   :  { %2096 = vrot.lane.b32.xlu0 %v1681_v10, %s4027_s20  ;;  %v2042_v33 = vsel %vm1699_vm7, %v1681_v10, 0  ;;  %v3129_v10 = vld [vmem:[#allocation13] ss:$0 sm:$0xff] }
 0xaca   :  { %v1694_v18 = vpop.permute.xlu1 %1693 }
 0xacb   :  { %v1701_v19 = vsel %vm1699_vm7, %v1694_v18, 0  ;;  %v1863_v25 = vpop.permute.xlu0 %1862 }
 0xacc   :  { %3393 = vmatpush3.bf16.msra.mxu1 %v1701_v19  ;;  %v1868_v26 = vsel %vm1699_vm7, %v1863_v25, 0 }
 0xacd   :  { %3398 = vmatprep.subr.bf16.mxu1 %v4025_v2 }
 0xacf   :  { %3395 = vmatmul.mubr.msk.bf16.vlgmr.msra.gmra.mrb[32].mxu1 %vm1695_vm8, %v3698_v20 }
 0xad0   :  { %3399 = vmatpush3.bf16.msra.mxu1 %v1753_v21  ;;  %3400 = vmatprep.mubr.msk.bf16.mxu1 %vm4026_vm2, %v4025_v2 }
 0xad1   :  { %3404 = vmatprep.subr.bf16.mxu1 %v4025_v2 }
 0xad2   :  { %v1980_v30 = vpop.permute.xlu1 %1979 }
 0xad3   :  { %v1985_v31 = vsel %vm1699_vm7, %v1980_v30, 0  ;;  %v2097_v35 = vpop.permute.xlu0 %2096 }
 0xad4   :  { %v2102_v36 = vsel %vm1699_vm7, %v2097_v35, 0 }
 0xadb   :  { %3401 = vmatmul.mubr.msk.bf16.vlgmr.msra.gmra.mrb[32].mxu1 %vm1695_vm8, %v3699_v22 }
 0xadc   :  { %3405 = vmatpush3.bf16.msra.mxu1 %v1808_v23  ;;  %3406 = vmatprep.mubr.msk.bf16.mxu1 %vm4026_vm2, %v4025_v2 }
 0xadd   :  { %3410 = vmatprep.subr.bf16.mxu1 %v4025_v2 }
 0xae7   :  { %3407 = vmatmul.mubr.msk.bf16.vlgmr.msra.gmra.mrb[32].mxu1 %vm1695_vm8, %v3700_v24 }
 0xae8   :  { %3411 = vmatpush3.bf16.msra.mxu1 %v1868_v26  ;;  %3412 = vmatprep.mubr.msk.bf16.mxu1 %vm4026_vm2, %v4025_v2  ;;  %v3736_v26 = vld [vmem:[%s4787_s21] sm:$0xff]  }
 0xae9   :  { %3416 = vmatprep.subr.bf16.mxu1 %v4025_v2 }
 0xaf3   :  { %3413 = vmatmul.mubr.msk.bf16.vlgmr.msra.gmra.mrb[32].mxu1 %vm1695_vm8, %v3701_v27 }
 0xaf4   :  { %3417 = vmatpush3.bf16.msra.mxu1 %v1925_v28  ;;  %3418 = vmatprep.mubr.msk.bf16.mxu1 %vm4026_vm2, %v4025_v2 }
 0xaf5   :  { %3422 = vmatprep.subr.bf16.mxu1 %v4025_v2 }
 0xaff   :  { %3419 = vmatmul.mubr.msk.bf16.vlgmr.msra.gmra.mrb[32].mxu1 %vm1695_vm8, %v3702_v29 }
 0xb00   :  { %3423 = vmatpush3.bf16.msra.mxu1 %v1985_v31  ;;  %3424 = vmatprep.mubr.msk.bf16.mxu1 %vm4026_vm2, %v4025_v2 }
 0xb01   :  { %3428 = vmatprep.subr.bf16.mxu1 %v4025_v2 }
 0xb0b   :  { %3425 = vmatmul.mubr.msk.bf16.vlgmr.msra.gmra.mrb[32].mxu1 %vm1695_vm8, %v3703_v32 }
 0xb0c   :  { %3429 = vmatpush3.bf16.msra.mxu1 %v2042_v33  ;;  %3430 = vmatprep.mubr.msk.bf16.mxu1 %vm4026_vm2, %v4025_v2  ;;  %v3737_v33 = vld [vmem:[%s4787_s21 + $0x8] sm:$0xff]  }
 0xb0d   :  { %3434 = vmatprep.subr.bf16.mxu1 %v4025_v2 }
 0xb17   :  { %3431 = vmatmul.mubr.msk.bf16.vlgmr.msra.gmra.mrb[32].mxu1 %vm1695_vm8, %v3704_v34  ;;  %v3738_v34 = vld [vmem:[%s4787_s21 + $0x10] sm:$0xff]  }
 0xb18   :  { %3435 = vmatpush3.bf16.msra.mxu1 %v2102_v36  ;;  %3436 = vmatprep.mubr.msk.bf16.mxu1 %vm4026_vm2, %v4025_v2 }
 0xb19   :  { %3470 = vmatprep.subr.bf16.mxu1 %v3728_v50 }
 0xb23   :  { %3437 = vmatmul.mubr.msk.bf16.vlgmr.msra.gmra.mrb[32].mxu1 %vm1695_vm8, %v3705_v37 }
 0xb24   :  { %3471 = vmatpush3.bf16.msra.mxu1 %v3728_v50 }
 0xb25   :  { %3472 = vmatprep.subr.bf16.mxu1 %v3729_v51 }
 0xb28   :  { %3473 = vmatpush3.bf16.msra.mxu1 %v3729_v51 }
 0xbf6   :  { %v2138_v40 = vpop.f32.mrb[32].mxu1 }
 0xbf7   :  { %v3438_v41 = vpop.f32.mrb[33].mxu1 }
 0xbf8   :  { %v2141_v42 = vpop.f32.mrb[34].mxu1  ;;  %v3741_v41 = vld [vmem:[%s4787_s21 + $0x28] sm:$0xff]  }
 0xbf9   :  { %v2147_v44 = vpack.c.bf16 %v2141_v42, %v2138_v40  ;;  %v3439_v45 = vpop.f32.mrb[35].mxu1 }
 0xbfb   :  { %3123 = vmatmul.mubr.msk.bf16.vlgmr.msra.gmra.mrb[24].mxu0 %vm932_vm3, %v2147_v44 }
 0xbfc   :  { %3441 = vmatpush3.bf16.msra.mxu0 %v3718_v43  ;;  %3448 = vmatprep.mubr.msk.bf16.mxu0 %vm4026_vm2, %v4025_v2 }
 0xbfd   :  { %3442 = vmatprep.subr.bf16.mxu0 %v4025_v2 }
 0xc00   :  { %3443 = vmatpush3.bf16.msra.mxu0 %v3719_v46 }
 0xc01   :  { %3444 = vmatprep.subr.bf16.mxu0 %v4025_v2 }
 0xc04   :  { %3445 = vmatpush3.bf16.msra.mxu0 %v3720_v47 }
 0xc05   :  { %3446 = vmatprep.subr.bf16.mxu0 %v4025_v2  ;;  %v3730_v2 = vld [vmem:[%s4788_s22 + $0x10] sm:$0xff]  }
 0xc06   :  { %3474 = vmatprep.subr.bf16.mxu1 %v3730_v2 }
 0xc07   :  { %3475 = vmatpush3.bf16.msra.mxu1 %v3730_v2 }
 0xc08   :  { %3447 = vmatpush3.bf16.msra.mxu0 %v3721_v48  ;;  %3476 = vmatprep.subr.bf16.mxu1 %v3731_v52 }
 0xc0b   :  { %3449 = vmatmul.mubr.msk.bf16.vlgmr.msra.gmra.mrb[28].mxu0 %vm932_vm3, %v2147_v44  ;;  %3477 = vmatpush3.bf16.msra.mxu1 %v3731_v52 }
 0xc0c   :  { %3454 = vmatprep.mubr.msk.bf16.mxu0 %vm202_vm0, %v3722_v49  ;;  %3478 = vmatprep.subr.bf16.mxu1 %v3732_v0 }
 0xc0f   :  { %3479 = vmatpush3.bf16.msra.mxu1 %v3732_v0 }
 0xc10   :  { %3480 = vmatprep.subr.bf16.mxu1 %v3733_v53 }
 0xc13   :  { %3481 = vmatpush3.bf16.msra.mxu1 %v3733_v53 }
 0xc14   :  { %3482 = vmatprep.subr.bf16.mxu1 %v3734_v8 }
 0xc17   :  { %3483 = vmatpush3.bf16.msra.mxu1 %v3734_v8 }
 0xc18   :  { %3484 = vmatprep.subr.bf16.mxu1 %v3735_v9 }
 0xc1b   :  { %3485 = vmatpush3.bf16.msra.mxu1 %v3735_v9 }
 0xcce   :  { %v2265_v54 = vpop.f32.mrb[24].mxu0 }
 0xccf   :  { %v2267_v55 = vpop.f32.mrb[25].mxu0 }
 0xcd0   :  { %v2269_v56 = vpop.f32.mrb[26].mxu0 }
 0xcd1   :  { %v2315_v57 = vpack.c.bf16 %v2269_v56, %v2265_v54  ;;  %v2271_v58 = vpop.f32.mrb[27].mxu0 }
 0xcd2   :  { %v2316_v59 = vpack.c.bf16 %v2271_v58, %v2267_v55 }
 0xcd3   :  { %3452 = vmatprep.subr.bf16.mxu0 %v2315_v57 }
 0xcd4   :  { %3453 = vmatpush3.bf16.msra.mxu0 %v2315_v57 }
 0xcd5   :  { %3458 = vmatprep.subr.bf16.mxu0 %v2316_v59 }
 0xcd7   :  { %3455 = vmatmul.mubr.msk.bf16.vlgmr.msra.gmra.mrb[32].mxu0 %vm202_vm0, %v3723_v60 }
 0xcd8   :  { %3459 = vmatpush3.bf16.msra.mxu0 %v2316_v59  ;;  %3460 = vmatprep.mubr.msk.bf16.mxu0 %vm202_vm0, %v3724_v61 }
 0xcde   :  { %v2308_v62 = vpop.f32.mrb[28].mxu0 }
 0xcdf   :  { %v3450_v63 = vpop.f32.mrb[29].mxu0 }
 0xce0   :  { %v2311_v3 = vpop.f32.mrb[30].mxu0 }
 0xce1   :  { %v2317_v5 = vpack.c.bf16 %v2311_v3, %v2308_v62  ;;  %v3451_v6 = vpop.f32.mrb[31].mxu0 }
 0xce3   :  { %3464 = vmatprep.subr.bf16.mxu0 %v2317_v5  ;;  %3461 = vmatmul.mubr.msk.bf16.vlgmr.msra.gmra.mrb[32].mxu0 %vm202_vm0, %v3725_v1 }
 0xce4   :  { %3465 = vmatpush3.bf16.msra.mxu0 %v2317_v5  ;;  %3466 = vmatprep.mubr.msk.bf16.mxu0 %vm202_vm0, %v3726_v4 }
 0xcef   :  { %3467 = vmatmul.mubr.msk.bf16.vlgmr.msra.gmra.mrb[32].mxu0 %vm202_vm0, %v3727_v7 }
 0xcf0   :  { %3494 = vmatprep.mubr.msk.bf16.mxu0 %vm332_vm1, %v3736_v26 }
 0xdc2   :  { %v3468_v11 = vpop.f32.mrb[32].mxu0 }
 0xdc3   :  { %v3522_v12 = vadd.f32 %v3468_v11, %v3129_v10  ;;  %v2527_v14 = vpop.f32.mrb[33].mxu0 }
 0xdc4   :  { %v3523_v15 = vadd.f32 %v3129_v10, %v2527_v14  ;;  %v3469_v16 = vpop.f32.mrb[34].mxu0 }
 0xdc5   :  { %v3524_v17 = vadd.f32 %v3469_v16, %v3129_v10  ;;  %v2530_v18 = vpop.f32.mrb[35].mxu0  ;;  %v2548_v20 = vmax.f32 %v3522_v12, 0.0 }
 0xdc6   :  { %v3525_v19 = vadd.f32 %v3129_v10, %v2530_v18  ;;  %v2546_v22 = vmax.f32 %v3523_v15, 0.0 }
 0xdc7   :  { %v2549_v21 = vmax.f32 %v3524_v17, 0.0 }
 0xdc8   :  { %v2547_v23 = vmax.f32 %v3525_v19, 0.0 }
 0xdc9   :  { %v2551_v24 = vpack.c.bf16 %v2549_v21, %v2548_v20 }
 0xdca   :  { %v2550_v25 = vpack.c.bf16 %v2547_v23, %v2546_v22 }
 0xdcc   :  { %3486 = vmatprep.mubr.bf16.mxu1 %v2550_v25 }
 0xdcd   :  { %3487 = vmatmul.mubr.bf16.vlgmr.msra.gmra.mrb[36].mxu1 %v2551_v24 }
 0xea0   :  { %v3488_v27 = vpop.f32.mrb[36].mxu1 }
 0xea1   :  { %v2650_v28 = vpop.f32.mrb[37].mxu1 }
 0xea2   :  { %v3489_v29 = vpop.f32.mrb[38].mxu1 }
 0xea3   :  { %v2666_v30 = vpack.c.bf16 %v3489_v29, %v3488_v27  ;;  %v2653_v31 = vpop.f32.mrb[39].mxu1 }
 0xea4   :  { %v2665_v32 = vpack.c.bf16 %v2653_v31, %v2650_v28 }
 0xea5   :  { %2766 = vrot.lane.b32.xlu0 %v2666_v30, %s4031_s28 }
 0xea6   :  { %2764 = vrot.lane.b32.xlu1 %v2665_v32, %s4031_s28  ;;  %3490 = vmatprep.subr.bf16.mxu0 %v2665_v32 }
 0xea7   :  { %3491 = vmatpush3.bf16.msra.mxu0 %v2665_v32 }
 0xea8   :  { %3492 = vmatprep.subr.bf16.mxu0 %v2666_v30 }
 0xea9   :  { %2846 = vrot.lane.b32.xlu0 %v2666_v30, %s4029_s27 }
 0xeaa   :  { %2844 = vrot.lane.b32.xlu1 %v2665_v32, %s4029_s27 }
 0xeab   :  { %3493 = vmatpush3.bf16.msra.mxu0 %v2666_v30 }
 0xeae   :  { %1446 = vrot.lane.b32.xlu1 %v4496_v13, %s4030_s7  ;;  %3495 = vmatmul.mubr.msk.bf16.vlgmr.msra.gmra.mrb[36].mxu0 %vm332_vm1, %v3737_v33 }
 0xeaf   :  { %3502 = vmatprep.mubr.msk.bf16.mxu0 %vm332_vm1, %v3738_v34 }
 0xf17   :  { %v2767_v36 = vpop.permute.xlu0 %2766 }
 0xf18   :  { %v2765_v35 = vpop.permute.xlu1 %2764 }
 0xf19   :  { %3498 = vmatprep.subr.bf16.mxu0 %v2765_v35 }
 0xf1a   :  { %3499 = vmatpush3.bf16.msra.mxu0 %v2765_v35 }
 0xf1b   :  { %3500 = vmatprep.subr.bf16.mxu0 %v2767_v36  ;;  %v2847_v40 = vpop.permute.xlu0 %2846 }
 0xf1c   :  { %v2845_v37 = vpop.permute.xlu1 %2844 }
 0xf1e   :  { %3501 = vmatpush3.bf16.msra.mxu0 %v2767_v36 }
 0xf1f   :  { %3506 = vmatprep.subr.bf16.mxu0 %v2845_v37 }
 0xf20   :  { %v1447_v13 = vpop.permute.xlu1 %1446 }
 0xf21   :  { %1449 = vst.msk [vmem:[#allocation19] sm:$0x3] %vm1443_vm4, %v1447_v13  ;;  %3503 = vmatmul.mubr.msk.bf16.vlgmr.msra.gmra.mrb[36].mxu0 %vm332_vm1, %v3739_v38 }
 0xf22   :  { %3507 = vmatpush3.bf16.msra.mxu0 %v2845_v37  ;;  %3510 = vmatprep.mubr.msk.bf16.mxu0 %vm332_vm1, %v3740_v39 }
 0xf23   :  { %3508 = vmatprep.subr.bf16.mxu0 %v2847_v40 }
 0xf26   :  { %3509 = vmatpush3.bf16.msra.mxu0 %v2847_v40 }
 0xf2d   :  { %3511 = vmatmul.mubr.msk.bf16.vlgmr.msra.gmra.mrb[36].mxu0 %vm332_vm1, %v3741_v41 }
 0xf2e   :  { %3947 = shalt.err (!%p3944_p12)
}
 0xf2f   :  { %s3948_s0 = scalar_lea.hbm %s4791_s25, 32 }
 0xf30   :  { %p3949_p13 = scmp.ne.s32.totalorder %s4791_s25, %s3948_s0  ;;  %p3952_p0 = scmp.lt.u32.totalorder %s3948_s0, %s4791_s25 }
 0xf32   :  { %p3954_p1 = pnand %p3952_p0, %p3949_p13 }
 0xf34   :  { %3957 = shalt.err (!%p3954_p1)
}
 0xf35   :  { %2958 = dma.vmem_to_hbm [thread:$0]  %s2956_s2, 32, %s4791_s25, [#allocation18]  }
 0xf36   :  { %s4033_s16 = smov [#allocation19]  }
 0xf37   :  { %s2965_s15 = sshll.u32 %s4033_s16, 4  ;;  %s2966_s15 = int_to_ptr.vmem [resolvable:$true] %s2965_s15 }
 0xf38   :  { %s3958_s5 = scalar_lea.vmem %s2966_s15, 32  ;;  %p3963_p3 = scmp.lt.s32.totalorder %s2966_s15, %s2966_s15 }
 0xf39   :  { %p3959_p2 = scmp.ne.s32.totalorder %s2966_s15, %s3958_s5  ;;  %p3964_p4 = scmp.lt.s32.totalorder %s3958_s5, %s3958_s5 }
 0xf3b   :  { %p3965_p5 = por %p3964_p4, %p3963_p3 }
 0xf3d   :  { %p3966_p6 = pnand %p3965_p5, %p3959_p2 }
 0xf3f   :  { %3969 = shalt.err (!%p3966_p6)
}
 0xf40   :  { %s3970_s28 = scalar_lea.hbm %s4792_s26, 32 }
 0xf41   :  { %p3971_p7 = scmp.ne.s32.totalorder %s4792_s26, %s3970_s28  ;;  %p3974_p8 = scmp.lt.u32.totalorder %s3970_s28, %s4792_s26 }
 0xf43   :  { %p3976_p9 = pnand %p3974_p8, %p3971_p7 }
 0xf45   :  { %3979 = shalt.err (!%p3976_p9)
}
 0xf46   :  { %2968 = dma.vmem_to_hbm [thread:$0]  %s2966_s15, 32, %s4792_s26, [#allocation18]   ;;  %v3158_v42 = vld [vmem:[#allocation14] ss:$0 sm:$0xff] }
 0xf47   :  { %s4034_s26 = smov [#allocation16]  }
 0xf48   :  { %s2942_s13 = sshll.u32 %s4034_s26, 4  ;;  %s2943_s13 = int_to_ptr.vmem [resolvable:$true] %s2942_s13 }
 0xf49   :  { %s3980_s10 = scalar_lea.vmem %s2943_s13, 512  ;;  %p3985_p11 = scmp.lt.s32.totalorder %s2943_s13, %s2943_s13 }
 0xf4a   :  { %p3981_p10 = scmp.ne.s32.totalorder %s2943_s13, %s3980_s10  ;;  %p3986_p12 = scmp.lt.s32.totalorder %s3980_s10, %s3980_s10 }
 0xf4c   :  { %p3987_p13 = por %p3986_p12, %p3985_p11 }
 0xf4e   :  { %p3988_p0 = pnand %p3987_p13, %p3981_p10 }
0x1000   :  { %v3512_v43 = vpop.f32.mrb[36].mxu0 }
0x1001   :  { %v3526_v44 = vadd.f32 %v3512_v43, %v3158_v42  ;;  %v2890_v45 = vpop.f32.mrb[37].mxu0 }
0x1002   :  { %v3527_v46 = vadd.f32 %v3158_v42, %v2890_v45  ;;  %v3513_v47 = vpop.f32.mrb[38].mxu0 }
0x1003   :  { %v3177_v48 = vmul.f32 -1.442695, %v3526_v44  ;;  %v3528_v49 = vadd.f32 %v3513_v47, %v3158_v42  ;;  %v2893_v50 = vpop.f32.mrb[39].mxu0 }
0x1004   :  { %v3175_v51 = vmul.f32 -1.442695, %v3527_v46  ;;  %v3529_v2 = vadd.f32 %v3158_v42, %v2893_v50 }
0x1005   :  { %3744 = vpow2.f32 %v3177_v48  ;;  %v3178_v52 = vmul.f32 -1.442695, %v3528_v49 }
0x1006   :  { %3746 = vpow2.f32 %v3175_v51  ;;  %v3176_v0 = vmul.f32 -1.442695, %v3529_v2 }
0x1007   :  { %3748 = vpow2.f32 %v3178_v52 }
0x1008   :  { %3750 = vpow2.f32 %v3176_v0 }
0x100f   :  { %v3745_v53 = vpop.eup %3744 }
0x1010   :  { %v3747_v54 = vpop.eup %3746  ;;  %v2923_v55 = vadd.f32 1.0, %v3745_v53 }
0x1011   :  { %v3749_v56 = vpop.eup %3748  ;;  %v2921_v57 = vadd.f32 1.0, %v3747_v54 }
0x1012   :  { %v3751_v58 = vpop.eup %3750  ;;  %3752 = vrcp.f32 %v2923_v55  ;;  %v2924_v59 = vadd.f32 1.0, %v3749_v56 }
0x1013   :  { %3754 = vrcp.f32 %v2921_v57  ;;  %v2922_v60 = vadd.f32 1.0, %v3751_v58 }
0x1014   :  { %3756 = vrcp.f32 %v2924_v59 }
0x1015   :  { %3758 = vrcp.f32 %v2922_v60 }
0x101c   :  { %v3753_v61 = vpop.eup %3752 }
0x101d   :  { %v3755_v62 = vpop.eup %3754  ;;  %2935 = vst.msk [vmem:[#allocation16 + $0x10] sm:$0xff] %vm202_vm0, %v3753_v61 }
0x101e   :  { %v3757_v63 = vpop.eup %3756  ;;  %2933 = vst.msk [vmem:[#allocation16] sm:$0xff] %vm202_vm0, %v3755_v62 }
0x101f   :  { %v3759_v1 = vpop.eup %3758  ;;  %2936 = vst.msk [vmem:[#allocation16 + $0x18] sm:$0xff] %vm202_vm0, %v3757_v63 }
0x1020   :  { %2934 = vst.msk [vmem:[#allocation16 + $0x8] sm:$0xff] %vm202_vm0, %v3759_v1 }
0x1021   :  { %3991 = shalt.err (!%p3988_p0)
}
0x1022   :  { %s3992_s23 = scalar_lea.hbm %s4790_s24, 512 }
0x1023   :  { %p3993_p1 = scmp.ne.s32.totalorder %s4790_s24, %s3992_s23  ;;  %p3996_p2 = scmp.lt.u32.totalorder %s3992_s23, %s4790_s24 }
0x1025   :  { %p3998_p3 = pnand %p3996_p2, %p3993_p1 }
0x1027   :  { %4001 = shalt.err (!%p3998_p3)
}
0x1028   :  { %s4035_s4 = smov 128   ;;  %s4036_s0 = smov 8  }
0x1029   :  { %2948 = dma.vmem_to_hbm [thread:$0]  %s2943_s13, 512, %s4790_s24, [#allocation4], %s4035_s4, %s4035_s4, %s4036_s0  }
0x102a   :  { %4012 = dma.done.wait [#allocation4], 512  }
0x102b   :  { %4013 = vsyncadd [#allocation4], 4294966784 }
0x102c   :  { %4014 = dma.done.wait [#allocation18], 64  }
0x102d   :  { %4015 = vsyncadd [#allocation18], 4294967232 }
0x102e   :  { %2978 = vsyncpa [#allocation3], 1 }
0x102f   :  { %2979 = vsyncpa [#allocation6], 1 }
0x1030   :  { %2980 = vsyncpa [#allocation9], 1 }
0x1031   :  { %2981 = vsyncpa [#allocation12], 1 }
0x1032   :  { %2982 = vsyncpa [#allocation15], 1 }
0x1033   :  { %2983 = vsyncpa [#allocation4], 1 }
0x1034   :  { %2984 = vsyncpa [#allocation18], 1 }

</bundles_post_ra>
